<compile_context>
chip_gen: v6e
topology: v6e:2x2x1
jax: 0.10.0
libtpu: 0.0.40
codegen_flags: <defaults>
</compile_context>

<pallas_src>
import functools
import math

import jax
import jax.numpy as jnp
from jax.experimental import pallas as pl
from jax.experimental.pallas import tpu as pltpu


def _sle_kernel(x_ref, k_ref, o_ref):
    # x_ref: (B_tile, C, S)  activation tile, S = H*W lane-dense
    # k_ref: (C, S, F)       learned spatial kernel (grid-invariant, resident)
    # o_ref: (B_tile, C*F)   output tile, already in final flattened layout
    C, S, F = k_ref.shape
    # C independent (B_tile, S) @ (S, F) MXU matmuls; no transposes anywhere.
    for c in range(C):  # static unroll — C is a small, static constant
        o_ref[:, c * F:(c + 1) * F] = jnp.dot(
            x_ref[:, c, :],
            k_ref[c],
            preferred_element_type=jnp.float32,
            # Exact f32 fidelity with the PyTorch reference; extra MXU passes
            # are hidden under the feature DMA (op is bandwidth-bound).
            precision=jax.lax.Precision.HIGHEST,
        ).astype(o_ref.dtype)


def _pick_b_tile(batch, channel, spatial, itemsize):
    """Largest batch tile that keeps the feature block ~<=4 MiB (double-buffered
    ~8 MiB) and satisfies TPU block-shape rules (multiple of 8 or == full dim)."""
    if batch <= 8:
        return batch  # full batch in one block (== array dim, always legal)
    budget = 4 << 20
    rows = budget // max(1, channel * spatial * itemsize)
    bt = min(batch, 128, max(8, rows))
    return max(8, (bt // 8) * 8)


@functools.partial(jax.jit, static_argnames=("b_tile",))
def spatial_learned_embeddings(features, kernel, *, b_tile=None):
    """features: (B, C, H, W) f32, kernel: (C, H, W, F) f32 -> (B, C*F) f32."""
    B, C, H, W = features.shape
    Ck, Hk, Wk, F = kernel.shape
    assert (C, H, W) == (Ck, Hk, Wk), (features.shape, kernel.shape)
    S = H * W

    # Free view-reshapes only (no HBM copies): contraction dim S goes last.
    x = features.reshape(B, C, S)   # (B, C, S)
    k = kernel.reshape(C, S, F)     # (C, S, F)

    if b_tile is None:
        b_tile = _pick_b_tile(B, C, S, jnp.dtype(features.dtype).itemsize)
    grid = (pl.cdiv(B, b_tile),)

    return pl.pallas_call(
        _sle_kernel,
        out_shape=jax.ShapeDtypeStruct((B, C * F), jnp.float32),
        grid=grid,
        in_specs=[
            # Batch-tiled activations; last two dims are full extents.
            pl.BlockSpec((b_tile, C, S), lambda i: (i, 0, 0)),
            # Grid-invariant weights: fetched once, stay resident in VMEM.
            pl.BlockSpec((C, S, F), lambda i: (0, 0, 0)),
        ],
        # Output already in final (B, C*F) layout -> no post-kernel ops at all.
        out_specs=pl.BlockSpec((b_tile, C * F), lambda i: (i, 0)),
        compiler_params=pltpu.CompilerParams(
            dimension_semantics=("parallel",),
        ),
    )(x, k)


def init_kernel(key, channel, height, width, num_features):
    """Mimic nn.init.kaiming_normal_(mode='fan_in', nonlinearity='linear')."""
    # For a (C, H, W, F) tensor, PyTorch's fan_in = dim1 * receptive = H * W * F.
    fan_in = height * width * num_features
    std = 1.0 / math.sqrt(fan_in)
    return std * jax.random.normal(
        key, (channel, height, width, num_features), jnp.float32
    )


def _reference(features, kernel):
    # Exact mirror of the PyTorch forward: broadcast multiply, sum over (H, W),
    # then flatten (B, C, F) -> (B, C*F) exactly like `.view(B, -1)`.
    out = (features[..., None] * kernel[None, ...]).sum(axis=(2, 3))  # (B, C, F)
    return out.reshape(features.shape[0], -1)


if __name__ == "__main__":
    B, C, H, W, F = 2, 4, 16, 16, 8
    key = jax.random.PRNGKey(0)
    kx, kk = jax.random.split(key)
    x = jax.random.normal(kx, (B, C, H, W), jnp.float32)
    kern = init_kernel(kk, C, H, W, F)

    out = jax.block_until_ready(spatial_learned_embeddings(x, kern))
    ref = jax.block_until_ready(_reference(x, kern))
    assert out.shape == ref.shape == (B, C * F), (out.shape, ref.shape)
    assert jnp.allclose(out, ref, atol=1e-4, rtol=1e-4), float(
        jnp.max(jnp.abs(out - ref))
    )
    print("KERNEL_OK")
</pallas_src>

<mosaic_0001>
module attributes {stable_mosaic.version = 11 : i64} {
  func.func @_sle_kernel(%arg0: i32, %arg1: memref<2x4x256xf32, #tpu.memory_space<vmem>>, %arg2: memref<4x256x8xf32, #tpu.memory_space<vmem>>, %arg3: memref<2x32xf32, #tpu.memory_space<vmem>>) attributes {dimension_semantics = [#tpu.dimension_semantics<parallel>], iteration_bounds = array<i64: 1>, scalar_prefetch = 0 : i64, scratch_operands = 0 : i64, tpu.core_type = #tpu.core_type<tc>, window_params = [{transform_indices = @transform_0, window_bounds = array<i64: 2, 4, 256>}, {pipeline_mode = #tpu.pipeline_mode<synchronous>, transform_indices = @transform_1, window_bounds = array<i64: 4, 256, 8>}, {transform_indices = @transform_2, window_bounds = array<i64: 2, 32>}]} {
    %c0 = arith.constant 0 : index
    %c0_0 = arith.constant 0 : index
    %c0_1 = arith.constant 0 : index
    %0 = vector.load %arg1[%c0, %c0_0, %c0_1] : memref<2x4x256xf32, #tpu.memory_space<vmem>>, vector<2x1x256xf32>
    %1 = vector.shape_cast %0 : vector<2x1x256xf32> to vector<2x256xf32>
    %c0_2 = arith.constant 0 : index
    %c0_3 = arith.constant 0 : index
    %c0_4 = arith.constant 0 : index
    %2 = vector.load %arg2[%c0_2, %c0_3, %c0_4] : memref<4x256x8xf32, #tpu.memory_space<vmem>>, vector<1x256x8xf32>
    %3 = vector.shape_cast %2 : vector<1x256x8xf32> to vector<256x8xf32>
    %cst = arith.constant dense<0.000000e+00> : vector<2x8xf32>
    %4 = tpu.matmul %1, %3, %cst {dimension_numbers = #tpu.dot_dimension_numbers<[1], [0], [0], [1], [0, 0, 1, 1], [], []>, precision = #tpu.contract_precision<fp32>} : vector<2x256xf32>, vector<256x8xf32>, vector<2x8xf32> -> vector<2x8xf32>
    %c0_5 = arith.constant 0 : index
    %c0_6 = arith.constant 0 : index
    %5 = vector.load %arg3[%c0_5, %c0_6] : memref<2x32xf32, #tpu.memory_space<vmem>>, vector<2x8xf32>
    tpu.vector_store %arg3[%c0_5, %c0_6], %4 {strides = array<i32>} : memref<2x32xf32, #tpu.memory_space<vmem>>, vector<2x8xf32>,
    %c0_7 = arith.constant 0 : index
    %c1 = arith.constant 1 : index
    %c0_8 = arith.constant 0 : index
    %6 = vector.load %arg1[%c0_7, %c1, %c0_8] : memref<2x4x256xf32, #tpu.memory_space<vmem>>, vector<2x1x256xf32>
    %7 = vector.shape_cast %6 : vector<2x1x256xf32> to vector<2x256xf32>
    %c1_9 = arith.constant 1 : index
    %c0_10 = arith.constant 0 : index
    %c0_11 = arith.constant 0 : index
    %8 = vector.load %arg2[%c1_9, %c0_10, %c0_11] : memref<4x256x8xf32, #tpu.memory_space<vmem>>, vector<1x256x8xf32>
    %9 = vector.shape_cast %8 : vector<1x256x8xf32> to vector<256x8xf32>
    %cst_12 = arith.constant dense<0.000000e+00> : vector<2x8xf32>
    %10 = tpu.matmul %7, %9, %cst_12 {dimension_numbers = #tpu.dot_dimension_numbers<[1], [0], [0], [1], [0, 0, 1, 1], [], []>, precision = #tpu.contract_precision<fp32>} : vector<2x256xf32>, vector<256x8xf32>, vector<2x8xf32> -> vector<2x8xf32>
    %c0_13 = arith.constant 0 : index
    %c8 = arith.constant 8 : index
    %11 = vector.load %arg3[%c0_13, %c8] : memref<2x32xf32, #tpu.memory_space<vmem>>, vector<2x8xf32>
    tpu.vector_store %arg3[%c0_13, %c8], %10 {strides = array<i32>} : memref<2x32xf32, #tpu.memory_space<vmem>>, vector<2x8xf32>,
    %c0_14 = arith.constant 0 : index
    %c2 = arith.constant 2 : index
    %c0_15 = arith.constant 0 : index
    %12 = vector.load %arg1[%c0_14, %c2, %c0_15] : memref<2x4x256xf32, #tpu.memory_space<vmem>>, vector<2x1x256xf32>
    %13 = vector.shape_cast %12 : vector<2x1x256xf32> to vector<2x256xf32>
    %c2_16 = arith.constant 2 : index
    %c0_17 = arith.constant 0 : index
    %c0_18 = arith.constant 0 : index
    %14 = vector.load %arg2[%c2_16, %c0_17, %c0_18] : memref<4x256x8xf32, #tpu.memory_space<vmem>>, vector<1x256x8xf32>
    %15 = vector.shape_cast %14 : vector<1x256x8xf32> to vector<256x8xf32>
    %cst_19 = arith.constant dense<0.000000e+00> : vector<2x8xf32>
    %16 = tpu.matmul %13, %15, %cst_19 {dimension_numbers = #tpu.dot_dimension_numbers<[1], [0], [0], [1], [0, 0, 1, 1], [], []>, precision = #tpu.contract_precision<fp32>} : vector<2x256xf32>, vector<256x8xf32>, vector<2x8xf32> -> vector<2x8xf32>
    %c0_20 = arith.constant 0 : index
    %c16 = arith.constant 16 : index
    %17 = vector.load %arg3[%c0_20, %c16] : memref<2x32xf32, #tpu.memory_space<vmem>>, vector<2x8xf32>
    tpu.vector_store %arg3[%c0_20, %c16], %16 {strides = array<i32>} : memref<2x32xf32, #tpu.memory_space<vmem>>, vector<2x8xf32>,
    %c0_21 = arith.constant 0 : index
    %c3 = arith.constant 3 : index
    %c0_22 = arith.constant 0 : index
    %18 = vector.load %arg1[%c0_21, %c3, %c0_22] : memref<2x4x256xf32, #tpu.memory_space<vmem>>, vector<2x1x256xf32>
    %19 = vector.shape_cast %18 : vector<2x1x256xf32> to vector<2x256xf32>
    %c3_23 = arith.constant 3 : index
    %c0_24 = arith.constant 0 : index
    %c0_25 = arith.constant 0 : index
    %20 = vector.load %arg2[%c3_23, %c0_24, %c0_25] : memref<4x256x8xf32, #tpu.memory_space<vmem>>, vector<1x256x8xf32>
    %21 = vector.shape_cast %20 : vector<1x256x8xf32> to vector<256x8xf32>
    %cst_26 = arith.constant dense<0.000000e+00> : vector<2x8xf32>
    %22 = tpu.matmul %19, %21, %cst_26 {dimension_numbers = #tpu.dot_dimension_numbers<[1], [0], [0], [1], [0, 0, 1, 1], [], []>, precision = #tpu.contract_precision<fp32>} : vector<2x256xf32>, vector<256x8xf32>, vector<2x8xf32> -> vector<2x8xf32>
    %c0_27 = arith.constant 0 : index
    %c24 = arith.constant 24 : index
    %23 = vector.load %arg3[%c0_27, %c24] : memref<2x32xf32, #tpu.memory_space<vmem>>, vector<2x8xf32>
    tpu.vector_store %arg3[%c0_27, %c24], %22 {strides = array<i32>} : memref<2x32xf32, #tpu.memory_space<vmem>>, vector<2x8xf32>,
    return
  }
  func.func @transform_0(%arg0: i32) -> (i32, i32, i32) {
    %c0_i32 = arith.constant 0 : i32
    %c0_i32_0 = arith.constant 0 : i32
    %c0_i32_1 = arith.constant 0 : i32
    return %arg0, %c0_i32, %c0_i32_0 : i32, i32, i32
  }
  func.func @transform_1(%arg0: i32) -> (i32, i32, i32) {
    %c0_i32 = arith.constant 0 : i32
    %c0_i32_0 = arith.constant 0 : i32
    %c0_i32_1 = arith.constant 0 : i32
    %c0_i32_2 = arith.constant 0 : i32
    return %c0_i32, %c0_i32_0, %c0_i32_1 : i32, i32, i32
  }
  func.func @transform_2(%arg0: i32) -> (i32, i32) {
    %c0_i32 = arith.constant 0 : i32
    %c0_i32_0 = arith.constant 0 : i32
    return %arg0, %c0_i32 : i32, i32
  }
}

</mosaic_0001>

<bundles_post_ra>
// kernel: spatial_learned_embeddings.1
= control target key start
LH: loop header
LB: loop body
LE: loop exit
PB: predicated region body
PF: predicated region fallthrough
CT: control target
= control target key end

     0   :  { %v4718_v16 = vmov 1966171168   ;;  %s7537_s0 = inlined_call_operand.vmem [shape: f32[2,4,256], index: 0, kind: input, shape index: {}]   ;;  %s7538_s1 = inlined_call_operand.vmem [shape: f32[4,256,8], index: 1, kind: input, shape index: {}]   ;;  %s7539_s2 = inlined_call_operand.hbm [shape: f32[2,32], index: 2, kind: output, shape index: {}]  }
   0x1   :  { %v46_v0 = vld [vmem:[%s7538_s1 + $0xf8] sm:$0xff]  ;;  %v45_v2 = vld [vmem:[%s7538_s1 + $0xf0] sm:$0xff]  ;;  %v44_v7 = vld [vmem:[%s7538_s1 + $0xe8] sm:$0xff]  ;;  %v4779_v17 = vunpack.c.l.s4 %v4718_v16 }
   0x2   :  { %v30_v1 = vld [vmem:[%s7538_s1 + $0x78] sm:$0xff]  ;;  %v4747_v3 = vand.u32 4294901760, %v46_v0  ;;  %v4751_v5 = vand.u32 4294901760, %v45_v2  ;;  %v29_v6 = vld [vmem:[%s7538_s1 + $0x70] sm:$0xff]  ;;  %v28_v8 = vld [vmem:[%s7538_s1 + $0x68] sm:$0xff]  ;;  %v4764_v11 = vand.u32 4294901760, %v44_v7 }
   0x3   :  { %v4749_v4 = vand.u32 4294901760, %v30_v1  ;;  %v4762_v10 = vand.u32 4294901760, %v29_v6  ;;  %v4766_v12 = vand.u32 4294901760, %v28_v8  ;;  %v43_v13 = vld [vmem:[%s7538_s1 + $0xe0] sm:$0xff]  ;;  %v4777_v15 = vld [vmem:[%s7538_s1 + $0xd8] sm:$0xff]  ;;  %v4800_v23 = vld [vmem:[%s7538_s1 + $0xd0] sm:$0xff] }
   0x4   :  { %v27_v14 = vld [vmem:[%s7538_s1 + $0x60] sm:$0xff]  ;;  %3851 = vmatprep.subr.mxu0 %v4747_v3  ;;  %v4782_v18 = vand.u32 4294901760, %v43_v13  ;;  %v4787_v20 = vand.u32 4294901760, %v4777_v15  ;;  %v4790_v21 = vsub.f32 %v46_v0, %v4747_v3  ;;  %v4795_v22 = vld [vmem:[%s7538_s1 + $0x58] sm:$0xff]  ;;  %v4805_v24 = vld [vmem:[%s7538_s1 + $0x50] sm:$0xff]  ;;  %v4815_v27 = vand.u32 4294901760, %v4800_v23 }
   0x5   :  { %v4784_v19 = vand.u32 4294901760, %v27_v14  ;;  %3852 = vmatpush3.msra.mxu0 %v4749_v4  ;;  %v4809_v25 = vand.u32 4294901760, %v4795_v22  ;;  %v4812_v26 = vsub.f32 %v30_v1, %v4749_v4  ;;  %v4818_v28 = vsub.f32 %v45_v2, %v4751_v5  ;;  %v4823_v29 = vld [vmem:[%s7538_s1 + $0xc8] sm:$0xff]  ;;  %v4833_v31 = vld [vmem:[%s7538_s1 + $0xc0] sm:$0xff]  ;;  %v4885_v49 = vld [vmem:[%s7538_s1 + $0xb8] sm:$0xff] }
   0x6   :  { %7813 = vst [vmem:[#allocation5_spill] sm:$0xff] %v4790_v21  ;;  %v4828_v30 = vld [vmem:[%s7538_s1 + $0x48] sm:$0xff]  ;;  %3853 = vmatprep.subr.mxu0 %v4751_v5  ;;  %v7552_v32 = vand.u32 4294901760, %v4790_v21  ;;  %v4838_v33 = vand.u32 4294901760, %v4805_v24  ;;  %v4841_v34 = vsub.f32 %v29_v6, %v4762_v10  ;;  %v4844_v35 = vand.u32 4294901760, %v4823_v29  ;;  %v4858_v40 = vld [vmem:[%s7538_s1 + $0x40] sm:$0xff] }
   0x7   :  { %3854 = vmatpush3.msra.mxu0 %v4762_v10  ;;  %v7551_v36 = vand.u32 4294901760, %v4812_v26  ;;  %v7549_v37 = vand.u32 4294901760, %v4818_v28  ;;  %v4850_v38 = vsub.f32 %v44_v7, %v4764_v11  ;;  %v4853_v39 = vand.u32 4294901760, %v4828_v30  ;;  %v4898_v54 = vld [vmem:[%s7538_s1 + $0x38] sm:$0xff]  ;;  %v4908_v59 = vld [vmem:[%s7538_s1 + $0xb0] sm:$0xff]  ;;  %v5075_v9 = vld [vmem:[%s7538_s1 + $0x88] sm:$0xff] }
   0x8   :  { %3855 = vmatprep.subr.mxu0 %v4764_v11  ;;  %v302_v41 = vsub.f32 %v4790_v21, %v7552_v32  ;;  %v7547_v42 = vand.u32 4294901760, %v4841_v34  ;;  %v4866_v43 = vsub.f32 %v28_v8, %v4766_v12  ;;  %v4869_v44 = vand.u32 4294901760, %v4833_v31  ;;  %v4923_v0 = vld [vmem:[%s7538_s1 + $0x30] sm:$0xff]  ;;  %v4939_v8 = vld [vmem:[%s7538_s1 + $0xa8] sm:$0xff] }
   0x9   :  { %3856 = vmatpush3.msra.mxu0 %v4766_v12  ;;  %v190_v45 = vsub.f32 %v4812_v26, %v7551_v36  ;;  %v309_v46 = vsub.f32 %v4818_v28, %v7549_v37  ;;  %v7546_v47 = vand.u32 4294901760, %v4850_v38  ;;  %v4880_v48 = vsub.f32 %v43_v13, %v4782_v18  ;;  %v5048_v37 = vld [vmem:[%s7538_s1 + $0x90] sm:$0xff] }
   0xa   :  { %3857 = vmatprep.subr.mxu0 %v4782_v18  ;;  %v303_v50 = vand.u32 4294901760, %v302_v41  ;;  %v197_v51 = vsub.f32 %v4841_v34, %v7547_v42  ;;  %v7544_v52 = vand.u32 4294901760, %v4866_v43  ;;  %v4893_v53 = vand.u32 4294901760, %v4858_v40  ;;  %v4953_v41 = vld [vmem:[%s7538_s1 + $0x28] sm:$0xff]  ;;  %v5032_v42 = vld [vmem:[%s7538_s1 + $0x18] sm:$0xff] }
   0xb   :  { %3858 = vmatpush3.msra.mxu0 %v4784_v19  ;;  %v191_v55 = vand.u32 4294901760, %v190_v45  ;;  %v310_v56 = vand.u32 4294901760, %v309_v46  ;;  %v316_v57 = vsub.f32 %v4850_v38, %v7546_v47  ;;  %v7542_v58 = vand.u32 4294901760, %v4880_v48 }
   0xc   :  { %7814 = vst [vmem:[#allocation6_spill] sm:$0xff] %v4893_v53  ;;  %3859 = vmatprep.subr.mxu0 %v4787_v20  ;;  %3886 = vmatprep.subr.mxu1 %v303_v50  ;;  %v198_v60 = vand.u32 4294901760, %v197_v51  ;;  %v204_v61 = vsub.f32 %v4866_v43, %v7544_v52  ;;  %v4915_v62 = vsub.f32 %v27_v14, %v4784_v19  ;;  %v4918_v63 = vand.u32 4294901760, %v4885_v49 }
   0xd   :  { %3860 = vmatpush3.msra.mxu0 %v4809_v25  ;;  %3887 = vmatpush3.msra.mxu1 %v191_v55  ;;  %v317_v1 = vand.u32 4294901760, %v316_v57  ;;  %v323_v2 = vsub.f32 %v4880_v48, %v7542_v58  ;;  %v4931_v6 = vsub.f32 %v4777_v15, %v4787_v20  ;;  %v4934_v7 = vand.u32 4294901760, %v4898_v54 }
   0xe   :  { %7815 = vst [vmem:[#allocation7_spill] sm:$0xff] %v4918_v63  ;;  %3861 = vmatprep.subr.mxu0 %v4815_v27  ;;  %3888 = vmatprep.subr.mxu1 %v310_v56  ;;  %v205_v13 = vand.u32 4294901760, %v204_v61  ;;  %v7540_v14 = vand.u32 4294901760, %v4915_v62  ;;  %v4945_v16 = vsub.f32 %v4795_v22, %v4809_v25  ;;  %v4948_v15 = vand.u32 4294901760, %v4908_v59 }
   0xf   :  { %7816 = vst [vmem:[#allocation8_spill] sm:$0xff] %v4934_v7  ;;  %3862 = vmatpush3.msra.mxu0 %v4838_v33  ;;  %3889 = vmatpush3.msra.mxu1 %v198_v60  ;;  %v324_v45 = vand.u32 4294901760, %v323_v2  ;;  %v7541_v46 = vand.u32 4294901760, %v4931_v6  ;;  %v4959_v50 = vsub.f32 %v4800_v23, %v4815_v27  ;;  %v4962_v22 = vand.u32 4294901760, %v4923_v0  ;;  %v4979_v23 = vld [vmem:[%s7538_s1 + $0xa0] sm:$0xff] }
  0x10   :  { %7817 = vst [vmem:[#allocation9_spill] sm:$0xff] %v4948_v15  ;;  %3863 = vmatprep.subr.mxu0 %v4844_v35  ;;  %3890 = vmatprep.subr.mxu1 %v317_v1  ;;  %v211_v51 = vsub.f32 %v4915_v62, %v7540_v14  ;;  %v7543_v55 = vand.u32 4294901760, %v4945_v16  ;;  %v4971_v56 = vsub.f32 %v4805_v24, %v4838_v33  ;;  %v4974_v57 = vand.u32 4294901760, %v4939_v8 }
  0x11   :  { %7818 = vst [vmem:[#allocation10_spill] sm:$0xff] %v4962_v22  ;;  %3864 = vmatpush3.msra.mxu0 %v4853_v39  ;;  %3891 = vmatpush3.msra.mxu1 %v205_v13  ;;  %v330_v60 = vsub.f32 %v4931_v6, %v7541_v46  ;;  %v7545_v61 = vand.u32 4294901760, %v4959_v50  ;;  %v4988_v24 = vsub.f32 %v4823_v29, %v4844_v35  ;;  %v4991_v1 = vand.u32 4294901760, %v4953_v41  ;;  %v5005_v29 = vld [vmem:[%s7538_s1 + $0x20] sm:$0xff] }
  0x12   :  { %7819 = vst [vmem:[#allocation11_spill] sm:$0xff] %v4974_v57  ;;  %3865 = vmatprep.subr.mxu0 %v4869_v44  ;;  %3892 = vmatprep.subr.mxu1 %v324_v45  ;;  %v212_v2 = vand.u32 4294901760, %v211_v51  ;;  %v218_v13 = vsub.f32 %v4945_v16, %v7543_v55  ;;  %v7548_v14 = vand.u32 4294901760, %v4971_v56  ;;  %v5000_v46 = vsub.f32 %v4828_v30, %v4853_v39  ;;  %v5018_v30 = vld [vmem:[%s7538_s1 + $0x98] sm:$0xff] }
  0x13   :  { %7820 = vst [vmem:[#allocation12_spill] sm:$0xff] %v4991_v1  ;;  %3866 = vmatpush3.msra.mxu0 %v4893_v53  ;;  %v331_v58 = vand.u32 4294901760, %v330_v60  ;;  %v337_v45 = vsub.f32 %v4959_v50, %v7545_v61  ;;  %v7550_v51 = vand.u32 4294901760, %v4988_v24  ;;  %v5013_v55 = vand.u32 4294901760, %v4979_v23 }
  0x14   :  { %7821 = vst [vmem:[#allocation13_spill] sm:$0xff] %v5000_v46  ;;  %3893 = vmatpush3.msra.mxu1 %v212_v2  ;;  %3867 = vmatprep.subr.mxu0 %v4918_v63  ;;  %v219_v52 = vand.u32 4294901760, %v218_v13  ;;  %v225_v60 = vsub.f32 %v4971_v56, %v7548_v14  ;;  %v7553_v61 = vand.u32 4294901760, %v5000_v46  ;;  %v5027_v47 = vsub.f32 %v4833_v31, %v4869_v44 }
  0x15   :  { %7822 = vst [vmem:[#allocation14_spill] sm:$0xff] %v5013_v55  ;;  %3894 = vmatprep.subr.mxu1 %v331_v58  ;;  %3868 = vmatpush3.msra.mxu0 %v4934_v7  ;;  %v338_v2 = vand.u32 4294901760, %v337_v45  ;;  %v344_v13 = vsub.f32 %v4988_v24, %v7550_v51  ;;  %v5039_v14 = vand.u32 4294901760, %v5005_v29  ;;  %v5043_v31 = vsub.f32 %v4858_v40, %v4893_v53  ;;  %v5061_v40 = vld [vmem:[%s7538_s1 + $0x10] sm:$0xff] }
  0x16   :  { %7823 = vst [vmem:[#allocation15_spill] sm:$0xff] %v5027_v47  ;;  %3895 = vmatpush3.msra.mxu1 %v219_v52  ;;  %3869 = vmatprep.subr.mxu0 %v4948_v15  ;;  %v226_v58 = vand.u32 4294901760, %v225_v60  ;;  %v232_v45 = vsub.f32 %v5000_v46, %v7553_v61  ;;  %v7558_v51 = vand.u32 4294901760, %v5027_v47  ;;  %v5056_v36 = vand.u32 4294901760, %v5018_v30 }
  0x17   :  { %7824 = vst [vmem:[#allocation16_spill] sm:$0xff] %v5039_v14  ;;  %7825 = vst [vmem:[#allocation17_spill] sm:$0xff] %v5043_v31  ;;  %3896 = vmatprep.subr.mxu1 %v338_v2  ;;  %3870 = vmatpush3.msra.mxu0 %v4962_v22  ;;  %v345_v52 = vand.u32 4294901760, %v344_v13  ;;  %v5067_v32 = vsub.f32 %v4885_v49, %v4918_v63  ;;  %v5070_v61 = vand.u32 4294901760, %v5032_v42  ;;  %v5086_v60 = vand.u32 4294901760, %v5048_v37 }
  0x18   :  { %3897 = vmatpush3.msra.mxu1 %v226_v58  ;;  %3871 = vmatprep.subr.mxu0 %v4974_v57  ;;  %v233_v2 = vand.u32 4294901760, %v232_v45  ;;  %v351_v13 = vsub.f32 %v5027_v47, %v7558_v51  ;;  %v5083_v49 = vsub.f32 %v4898_v54, %v4934_v7  ;;  %v7829_v63 = vand.u32 4294901760, %v5043_v31  ;;  %v5103_v54 = vld [vmem:[%s7538_s1 + $0x8] sm:$0xff] }
  0x19   :  { %7826 = vst [vmem:[#allocation18_spill] sm:$0xff] %v5067_v32  ;;  %7828 = vst [vmem:[#allocation20_spill] sm:$0xff] %v5086_v60  ;;  %3898 = vmatprep.subr.mxu1 %v345_v52  ;;  %3872 = vmatpush3.msra.mxu0 %v4991_v1  ;;  %v5095_v53 = vsub.f32 %v4908_v59, %v4948_v15  ;;  %v5098_v51 = vand.u32 4294901760, %v5061_v40  ;;  %v5109_v45 = vsub.f32 %v4923_v0, %v4962_v22  ;;  %v5117_v15 = vld [vmem:[%s7538_s1 + $0x80] sm:$0xff] }
  0x1a   :  { %7827 = vst [vmem:[#allocation19_spill] sm:$0xff] %v5083_v49  ;;  %v239_v58 = vsub.f32 %v5043_v31, %v7829_v63  ;;  %3899 = vmatpush3.msra.mxu1 %v233_v2  ;;  %3873 = vmatprep.subr.mxu0 %v5013_v55  ;;  %v352_v52 = vand.u32 4294901760, %v351_v13  ;;  %v5112_v59 = vand.u32 4294901760, %v5075_v9 }
  0x1b   :  { %7830 = vst [vmem:[#allocation21_spill] sm:$0xff] %v5095_v53  ;;  %7831 = vst [vmem:[#allocation22_spill] sm:$0xff] %v5098_v51 }
  0x1c   :  { %7832 = vst [vmem:[#allocation23_spill] sm:$0xff] %v5112_v59 }
  0x1d   :  { %7 = vsyncpa [#allocation3], 0  ;;  %3874 = vmatpush3.msra.mxu0 %v5039_v14  ;;  %v240_v2 = vand.u32 4294901760, %v239_v58  ;;  %v7833_v13 = vand.u32 4294901760, %v5067_v32  ;;  %v7577_v7 = vand.u32 4294901760, %v5095_v53  ;;  %v5126_v0 = vsub.f32 %v4939_v8, %v4974_v57  ;;  %3900 = vmatprep.subr.mxu1 %v352_v52  ;;  %v5143_v8 = vld [vmem:[%s7538_s1] sm:$0xff] }
  0x1e   :  { %3875 = vmatprep.subr.mxu0 %v5056_v36  ;;  %v7835_v22 = vand.u32 4294901760, %v5083_v49  ;;  %v5134_v58 = vand.u32 4294901760, %v5103_v54  ;;  %v12_v52 = vld [vmem:[%s7537_s0] ss:$4 sm:$0x3]  ;;  %v5173_v46 = vand.u32 4294901760, %v5143_v8 }
  0x1f   :  { %v358_v63 = vsub.f32 %v5067_v32, %v7833_v13  ;;  %7834 = vst [vmem:[#allocation24_spill] sm:$0xff] %v5126_v0  ;;  %v5138_v13 = vsub.f32 %v4953_v41, %v4991_v1  ;;  %3901 = vmatpush3.msra.mxu1 %v240_v2  ;;  %3876 = vmatpush3.msra.mxu0 %v5070_v61  ;;  %v5154_v1 = vand.u32 4294901760, %v5117_v15  ;;  %v3748_v57 = vld [vmem:[%s7537_s0 + $0x8] ss:$4 sm:$0x3]  ;;  %vm936_vm0 = vcmask 58368  }
  0x20   :  { %v246_v31 = vsub.f32 %v5083_v49, %v7835_v22  ;;  %7836 = vst [vmem:[#allocation25_spill] sm:$0xff] %v5134_v58  ;;  %v365_v47 = vsub.f32 %v5095_v53, %v7577_v7  ;;  %3877 = vmatprep.subr.mxu0 %v5086_v60  ;;  %v5166_v7 = vsub.f32 %v4979_v23, %v5013_v55  ;;  %v7839_v53 = vand.u32 4294901760, %v5126_v0  ;;  %s4720_s27 = smov 16   ;;  %s4721_s28 = smov 24  }
  0x21   :  { %v359_v22 = vand.u32 4294901760, %v358_v63  ;;  %7837 = vst [vmem:[#allocation26_spill] sm:$0xff] %v5154_v1  ;;  %v7838_v63 = vand.u32 4294901760, %v5109_v45  ;;  %3878 = vmatpush3.msra.mxu0 %v5098_v51  ;;  %7840 = vst [vmem:[#allocation27_spill] sm:$0xff] %v5173_v46  ;;  %v7841_v23 = vand.u32 4294901760, %v5138_v13  ;;  %v49_v55 = vcombine.low %v12_v52, %v3748_v57  ;;  %s4722_s29 = smov [#allocation2]  }
  0x22   :  { %v247_v49 = vand.u32 4294901760, %v246_v31  ;;  %v366_v41 = vand.u32 4294901760, %v365_v47  ;;  %v372_v31 = vsub.f32 %v5126_v0, %v7839_v53  ;;  %3879 = vmatprep.subr.mxu0 %v5112_v59  ;;  %v5194_v57 = vsub.f32 %v5018_v30, %v5056_v36  ;;  %s3740_s30 = sshll.u32 %s4722_s29, 4  ;;  %s3741_s30 = int_to_ptr.vmem [resolvable:$true] %s3740_s30 }
  0x23   :  { %v253_v2 = vsub.f32 %v5109_v45, %v7838_v63  ;;  %3902 = vmatprep.subr.mxu1 %v359_v22  ;;  %v5177_v63 = vsub.f32 %v5005_v29, %v5039_v14  ;;  %v260_v47 = vsub.f32 %v5138_v13, %v7841_v23  ;;  %v7591_v22 = vand.u32 4294901760, %v5166_v7  ;;  %3880 = vmatpush3.msra.mxu0 %v5134_v58  ;;  %s4696_s3 = scalar_lea.vmem %s3741_s30, 32  ;;  %p4701_p1 = scmp.lt.s32.totalorder %s3741_s30, %s3741_s30 }
  0x24   :  { %3903 = vmatpush3.msra.mxu1 %v247_v49  ;;  %v373_v53 = vand.u32 4294901760, %v372_v31  ;;  %v52_v29 = vunpack.c.0.s8 %v4779_v17  ;;  %v7842_v14 = vlaneseq  ;;  %3881 = vmatprep.subr.mxu0 %v5154_v1  ;;  %v5198_v52 = vsub.f32 %v5032_v42, %v5070_v61  ;;  %p4697_p0 = scmp.ne.s32.totalorder %s3741_s30, %s4696_s3  ;;  %p4702_p2 = scmp.lt.s32.totalorder %s4696_s3, %s4696_s3 }
  0x25   :  { %v254_v32 = vand.u32 4294901760, %v253_v2  ;;  %3904 = vmatprep.subr.mxu1 %v366_v41  ;;  %v7589_v0 = vand.u32 4294901760, %v5177_v63  ;;  %v261_v2 = vand.u32 4294901760, %v260_v47  ;;  %v379_v23 = vsub.f32 %v5166_v7, %v7591_v22  ;;  %3882 = vmatpush3.msra.mxu0 %v5173_v46 }
  0x26   :  { %v54_v49 = vshrl.u32 %v7842_v14, 7  ;;  %v5208_v14 = vsub.f32 %v5048_v37, %v5086_v60  ;;  %v7588_v41 = vand.u32 4294901760, %v5194_v57  ;;  %3921 = vmatprep.subr.mxu0 %v4790_v21  ;;  %v7590_v42 = vand.u32 4294901760, %v5198_v52  ;;  %p4703_p3 = por %p4702_p2, %p4701_p1 }
  0x27   :  { %3905 = vmatpush3.msra.mxu1 %v254_v32  ;;  %v267_v17 = vsub.f32 %v5177_v63, %v7589_v0  ;;  %v380_v30 = vand.u32 4294901760, %v379_v23  ;;  %v5215_v31 = vsub.f32 %v5061_v40, %v5098_v51  ;;  %v5221_v37 = vsub.f32 %v5075_v9, %v5112_v59 }
  0x28   :  { %3906 = vmatprep.subr.mxu1 %v373_v53  ;;  %v5204_v32 = vsub.s32 %v52_v29, %v54_v49  ;;  %v7593_v29 = vand.u32 4294901760, %v5208_v14  ;;  %v386_v49 = vsub.f32 %v5194_v57, %v7588_v41  ;;  %vm1868_vm1 = vcmask 123968   ;;  %p4704_p4 = pnand %p4703_p3, %p4697_p0 }
  0x29   :  { %3907 = vmatpush3.msra.mxu1 %v261_v2  ;;  %v268_v47 = vand.u32 4294901760, %v267_v17  ;;  %v274_v2 = vsub.f32 %v5198_v52, %v7590_v42  ;;  %v7594_v40 = vand.u32 4294901760, %v5215_v31  ;;  %vm2800_vm2 = vcmask 189568  }
  0x2a   :  { %7843 = vst [vmem:[#allocation28_spill] sm:$0xff] %v5204_v32  ;;  %v56_v53 = vrot.slane %v49_v55, %v5204_v32  ;;  %3908 = vmatprep.subr.mxu1 %v380_v30  ;;  %v5232_v55 = vsub.f32 %v5103_v54, %v5134_v58  ;;  %v393_v17 = vsub.f32 %v5208_v14, %v7593_v29  ;;  %v7595_v30 = vand.u32 4294901760, %v5221_v37 }
  0x2b   :  { %3909 = vmatpush3.msra.mxu1 %v268_v47  ;;  %v387_v41 = vand.u32 4294901760, %v386_v49  ;;  %v275_v0 = vand.u32 4294901760, %v274_v2  ;;  %v281_v42 = vsub.f32 %v5215_v31, %v7594_v40  ;;  %v5254_v2 = vsub.f32 %v5117_v15, %v5154_v1 }
  0x2c   :  { %7844 = vst [vmem:[#allocation29_spill] sm:$0xff] %v5232_v55  ;;  %v57_v23 = vcombine.high %v56_v53, %v56_v53  ;;  %v64_v9 = vrot.slane %v56_v53, %v5204_v32  ;;  %v7596_v22 = vand.u32 4294901760, %v5232_v55  ;;  %v394_v21 = vand.u32 4294901760, %v393_v17 }
  0x2d   :  { %v400_v53 = vsub.f32 %v5221_v37, %v7595_v30  ;;  %3910 = vmatprep.subr.mxu1 %v387_v41  ;;  %v282_v29 = vand.u32 4294901760, %v281_v42  ;;  %v7600_v30 = vand.u32 4294901760, %v5254_v2  ;;  %vm3732_vm3 = vcmask 255168  }
  0x2e   :  { %v71_v54 = vrot.slane %v57_v23, %v5204_v32  ;;  %v5244_v47 = vand.u32 4294901760, %v64_v9  ;;  %v288_v49 = vsub.f32 %v5232_v55, %v7596_v22  ;;  %v5258_v23 = vsub.f32 %v5143_v8, %v5173_v46  ;;  %3911 = vmatpush3.msra.mxu1 %v275_v0 }
  0x2f   :  { %v401_v41 = vand.u32 4294901760, %v400_v53  ;;  %3912 = vmatprep.subr.mxu1 %v394_v21  ;;  %v407_v0 = vsub.f32 %v5254_v2, %v7600_v30  ;;  %v7857_v30 = vld [vmem:[#allocation21_spill] sm:$0xff] }
  0x30   :  { %7845 = vst [vmem:[#allocation30_spill] sm:$0xff] %v5244_v47  ;;  %v5260_v40 = vand.u32 4294901760, %v71_v54  ;;  %v5263_v17 = vsub.f32 %v64_v9, %v5244_v47  ;;  %v289_v42 = vand.u32 4294901760, %v288_v49  ;;  %v7599_v22 = vand.u32 4294901760, %v5258_v23  ;;  %3913 = vmatpush3.msra.mxu1 %v282_v29 }
  0x31   :  { %3914 = vmatprep.subr.mxu1 %v401_v41 }
  0x32   :  { %7846 = vst [vmem:[#allocation31_spill] sm:$0xff] %v5260_v40  ;;  %v5268_v15 = vsub.f32 %v71_v54, %v5260_v40  ;;  %v7601_v32 = vand.u32 4294901760, %v5263_v17  ;;  %411 = vmatprep.mubr.f32.mxu1 %v5260_v40  ;;  %v295_v21 = vsub.f32 %v5258_v23, %v7599_v22  ;;  %3915 = vmatpush3.msra.mxu1 %v289_v42  ;;  %v408_v54 = vand.u32 4294901760, %v407_v0  ;;  %v7847_v42 = vld [vmem:[#allocation13_spill] sm:$0xff]  ;;  %v7848_v0 = vld [vmem:[#allocation6_spill] sm:$0xff] }
  0x33   :  { %v7856_v22 = vld [vmem:[#allocation10_spill] sm:$0xff] }
  0x34   :  { %v7602_v8 = vand.u32 4294901760, %v5268_v15  ;;  %v179_v9 = vsub.f32 %v5263_v17, %v7601_v32  ;;  %v296_v29 = vand.u32 4294901760, %v295_v21  ;;  %3916 = vmatprep.subr.mxu1 %v408_v54  ;;  %v7849_v21 = vld [vmem:[#allocation15_spill] sm:$0xff]  ;;  %v7851_v54 = vld [vmem:[#allocation17_spill] sm:$0xff]  ;;  %v7861_v40 = vld [vmem:[#allocation14_spill] sm:$0xff] }
  0x35   :  { %v7858_v32 = vld [vmem:[#allocation11_spill] sm:$0xff] }
  0x36   :  { %v173_v53 = vsub.f32 %v5268_v15, %v7602_v8  ;;  %v180_v49 = vand.u32 4294901760, %v179_v9  ;;  %3917 = vmatpush3.msra.mxu1 %v296_v29  ;;  %v7850_v9 = vld [vmem:[#allocation7_spill] sm:$0xff]  ;;  %v7852_v29 = vld [vmem:[#allocation8_spill] sm:$0xff] }
  0x37   :  { %413 = vmatmul.mubr.f32.vlgmr.msra.gmra.mxu1 %v5244_v47  ;;  %3956 = vmatprep.subr.mxu1 %v4747_v3  ;;  %v7859_v8 = vld [vmem:[#allocation12_spill] sm:$0xff] }
  0x38   :  { %v174_v41 = vand.u32 4294901760, %v173_v53  ;;  %3957 = vmatpush3.msra.mxu1 %v4749_v4  ;;  %v7853_v53 = vld [vmem:[#allocation18_spill] sm:$0xff]  ;;  %v7860_v47 = vld [vmem:[#allocation24_spill] sm:$0xff] }
  0x39   :  { %3958 = vmatprep.subr.mxu1 %v4751_v5 }
  0x3a   :  { %175 = vmatprep.mubr.f32.mxu0 %v174_v41  ;;  %3959 = vmatpush3.msra.mxu1 %v4762_v10  ;;  %v7855_v41 = vld [vmem:[#allocation19_spill] sm:$0xff] }
  0x3b   :  { %181 = vmatmul.mubr.f32.vlgmr.msra.gmra.mxu0 %v180_v49  ;;  %3960 = vmatprep.subr.mxu1 %v4764_v11  ;;  %v7854_v49 = vld [vmem:[#allocation9_spill] sm:$0xff] }
  0x3c   :  { %3922 = vmatpush3.msra.mxu0 %v4812_v26  ;;  %3961 = vmatpush3.msra.mxu1 %v4766_v12 }
  0x3d   :  { %3923 = vmatprep.subr.mxu0 %v4818_v28  ;;  %3962 = vmatprep.subr.mxu1 %v4782_v18 }
  0x3e   :  { %3924 = vmatpush3.msra.mxu0 %v4841_v34  ;;  %3963 = vmatpush3.msra.mxu1 %v4784_v19 }
  0x3f   :  { %3925 = vmatprep.subr.mxu0 %v4850_v38  ;;  %3964 = vmatprep.subr.mxu1 %v4787_v20 }
  0x40   :  { %3926 = vmatpush3.msra.mxu0 %v4866_v43  ;;  %3965 = vmatpush3.msra.mxu1 %v4809_v25 }
  0x41   :  { %3927 = vmatprep.subr.mxu0 %v4880_v48  ;;  %3966 = vmatprep.subr.mxu1 %v4815_v27 }
  0x42   :  { %3928 = vmatpush3.msra.mxu0 %v4915_v62  ;;  %3967 = vmatpush3.msra.mxu1 %v4838_v33 }
  0x43   :  { %3929 = vmatprep.subr.mxu0 %v4931_v6  ;;  %3968 = vmatprep.subr.mxu1 %v4844_v35 }
  0x44   :  { %3930 = vmatpush3.msra.mxu0 %v4945_v16  ;;  %3969 = vmatpush3.msra.mxu1 %v4853_v39 }
  0x45   :  { %3931 = vmatprep.subr.mxu0 %v4959_v50  ;;  %3970 = vmatprep.subr.mxu1 %v4869_v44 }
  0x46   :  { %3932 = vmatpush3.msra.mxu0 %v4971_v56  ;;  %3971 = vmatpush3.msra.mxu1 %v7848_v0 }
  0x47   :  { %3933 = vmatprep.subr.mxu0 %v4988_v24  ;;  %3972 = vmatprep.subr.mxu1 %v7850_v9 }
  0x48   :  { %3934 = vmatpush3.msra.mxu0 %v7847_v42  ;;  %3973 = vmatpush3.msra.mxu1 %v7852_v29 }
  0x49   :  { %3935 = vmatprep.subr.mxu0 %v7849_v21  ;;  %3974 = vmatprep.subr.mxu1 %v7854_v49  ;;  %v7862_v49 = vld [vmem:[#allocation16_spill] sm:$0xff] }
  0x4a   :  { %3936 = vmatpush3.msra.mxu0 %v7851_v54  ;;  %3975 = vmatpush3.msra.mxu1 %v7856_v22 }
  0x4b   :  { %3937 = vmatprep.subr.mxu0 %v7853_v53  ;;  %3976 = vmatprep.subr.mxu1 %v7858_v32 }
  0x4c   :  { %3938 = vmatpush3.msra.mxu0 %v7855_v41  ;;  %3977 = vmatpush3.msra.mxu1 %v7859_v8 }
  0x4d   :  { %3939 = vmatprep.subr.mxu0 %v7857_v30  ;;  %3978 = vmatprep.subr.mxu1 %v7861_v40 }
  0x4e   :  { %3940 = vmatpush3.msra.mxu0 %v5109_v45  ;;  %548 = vmatprep.mubr.f32.mxu0 %v5268_v15 }
  0x4f   :  { %3941 = vmatprep.subr.mxu0 %v7860_v47  ;;  %3979 = vmatpush3.msra.mxu1 %v7862_v49 }
  0x50   :  { %3942 = vmatpush3.msra.mxu0 %v5138_v13  ;;  %3980 = vmatprep.subr.mxu1 %v5056_v36 }
  0x51   :  { %3943 = vmatprep.subr.mxu0 %v5166_v7  ;;  %3981 = vmatpush3.msra.mxu1 %v5070_v61 }
  0x52   :  { %3944 = vmatpush3.msra.mxu0 %v5177_v63  ;;  %3982 = vmatprep.subr.mxu1 %v5086_v60 }
  0x53   :  { %3945 = vmatprep.subr.mxu0 %v5194_v57  ;;  %3983 = vmatpush3.msra.mxu1 %v5098_v51  ;;  %v7863_v51 = vand.u32 4294901760, %v5268_v15  ;;  %v7889_v15 = vand.u32 4294901760, %v5109_v45 }
  0x54   :  { %3946 = vmatpush3.msra.mxu0 %v5198_v52  ;;  %3984 = vmatprep.subr.mxu1 %v5112_v59  ;;  %v7864_v59 = vld [vmem:[#allocation5_spill] sm:$0xff] }
  0x55   :  { %3947 = vmatprep.subr.mxu0 %v5208_v14  ;;  %3985 = vmatpush3.msra.mxu1 %v5134_v58  ;;  %v7865_v60 = vand.u32 4294901760, %v7864_v59  ;;  %v7866_v58 = vand.u32 4294901760, %v4812_v26  ;;  %v7871_v26 = vand.u32 4294901760, %v4866_v43  ;;  %v7878_v43 = vand.u32 4294901760, %v4988_v24  ;;  %v3779_v59 = vld [vmem:[%s7538_s1 + $0x1e0] sm:$0xff] }
  0x56   :  { %3948 = vmatpush3.msra.mxu0 %v5215_v31  ;;  %3986 = vmatprep.subr.mxu1 %v5154_v1  ;;  %v7868_v1 = vand.u32 4294901760, %v4818_v28  ;;  %v7872_v28 = vand.u32 4294901760, %v4880_v48 }
  0x57   :  { %3949 = vmatprep.subr.mxu0 %v5221_v37  ;;  %3987 = vmatpush3.msra.mxu1 %v5173_v46  ;;  %v7869_v46 = vand.u32 4294901760, %v4841_v34  ;;  %v7876_v34 = vand.u32 4294901760, %v4959_v50 }
  0x58   :  { %3950 = vmatpush3.msra.mxu0 %v5232_v55  ;;  %655 = vmatprep.mubr.f32.mxu1 %v7863_v51  ;;  %v7867_v55 = vand.u32 4294901760, %v5263_v17  ;;  %v7870_v51 = vand.u32 4294901760, %v4850_v38 }
  0x59   :  { %3951 = vmatprep.subr.mxu0 %v5254_v2  ;;  %4026 = vmatprep.subr.mxu1 %v4747_v3  ;;  %v7873_v3 = vand.u32 4294901760, %v4915_v62 }
  0x5a   :  { %3952 = vmatpush3.msra.mxu0 %v5258_v23  ;;  %659 = vmatmul.mubr.f32.vlgmr.msra.gmra.mxu1 %v7867_v55  ;;  %v3762_v55 = vld [vmem:[%s7538_s1 + $0x158] sm:$0xff] }
  0x5b   :  { %551 = vmatmul.mubr.f32.vlgmr.msra.gmra.mxu0 %v5263_v17  ;;  %3991 = vmatprep.subr.mxu0 %v7865_v60 }
  0x5c   :  { %3992 = vmatpush3.msra.mxu0 %v7866_v58  ;;  %4027 = vmatpush3.msra.mxu1 %v4749_v4  ;;  %v7874_v4 = vand.u32 4294901760, %v4931_v6  ;;  %v7881_v6 = vand.u32 4294901760, %v7849_v21  ;;  %v7887_v58 = vand.u32 4294901760, %v7857_v30  ;;  %v3778_v30 = vld [vmem:[%s7538_s1 + $0x1d8] sm:$0xff]  ;;  %v7890_v21 = vand.u32 4294901760, %v7860_v47  ;;  %v3777_v47 = vld [vmem:[%s7538_s1 + $0x1d0] sm:$0xff] }
  0x5d   :  { %3993 = vmatprep.subr.mxu0 %v7868_v1  ;;  %4028 = vmatprep.subr.mxu1 %v4751_v5  ;;  %v3766_v5 = vld [vmem:[%s7538_s1 + $0x178] sm:$0xff] }
  0x5e   :  { %3994 = vmatpush3.msra.mxu0 %v7869_v46  ;;  %4029 = vmatpush3.msra.mxu1 %v4762_v10  ;;  %v7875_v10 = vand.u32 4294901760, %v4945_v16  ;;  %v5398_v38 = vand.u32 4294901760, %v3766_v5  ;;  %v7882_v46 = vand.u32 4294901760, %v7851_v54  ;;  %v5476_v54 = vand.u32 4294901760, %v3779_v59 }
  0x5f   :  { %3995 = vmatprep.subr.mxu0 %v7870_v51  ;;  %4030 = vmatprep.subr.mxu1 %v4764_v11  ;;  %v3782_v11 = vld [vmem:[%s7538_s1 + $0x1f8] sm:$0xff]  ;;  %v5486_v51 = vand.u32 4294901760, %v3762_v55 }
  0x60   :  { %3996 = vmatpush3.msra.mxu0 %v7871_v26  ;;  %4031 = vmatpush3.msra.mxu1 %v4766_v12  ;;  %v3765_v12 = vld [vmem:[%s7538_s1 + $0x170] sm:$0xff]  ;;  %v5406_v48 = vand.u32 4294901760, %v3782_v11  ;;  %v5428_v50 = vsub.f32 %v3766_v5, %v5398_v38  ;;  %7892 = vst [vmem:[#allocation17_spill] sm:$0xff] %v5476_v54  ;;  %v3749_v5 = vld [vmem:[%s7537_s0 + $0x1] ss:$4 sm:$0x3] }
  0x61   :  { %3997 = vmatprep.subr.mxu0 %v7872_v28  ;;  %4032 = vmatprep.subr.mxu1 %v4782_v18  ;;  %v7877_v18 = vand.u32 4294901760, %v4971_v56  ;;  %v5408_v62 = vand.u32 4294901760, %v3765_v12  ;;  %v7884_v56 = vand.u32 4294901760, %v7853_v53  ;;  %7894 = vst [vmem:[#allocation8_spill] sm:$0xff] %v5486_v51  ;;  %v7895_v28 = vand.u32 4294901760, %v5166_v7 }
  0x62   :  { %3998 = vmatpush3.msra.mxu0 %v7873_v3  ;;  %4033 = vmatpush3.msra.mxu1 %v4784_v19  ;;  %v3781_v19 = vld [vmem:[%s7538_s1 + $0x1f0] sm:$0xff]  ;;  %v5442_v1 = vsub.f32 %v3782_v11, %v5406_v48  ;;  %v7897_v7 = vand.u32 4294901760, %v5177_v63 }
  0x63   :  { %3999 = vmatprep.subr.mxu0 %v7874_v4  ;;  %4034 = vmatprep.subr.mxu1 %v4787_v20  ;;  %7879 = vst [vmem:[#allocation13_spill] sm:$0xff] %v5408_v62  ;;  %v3764_v20 = vld [vmem:[%s7538_s1 + $0x168] sm:$0xff]  ;;  %v5419_v16 = vand.u32 4294901760, %v3781_v19  ;;  %v5439_v24 = vsub.f32 %v3765_v12, %v5408_v62 }
  0x64   :  { %4000 = vmatpush3.msra.mxu0 %v7875_v10  ;;  %4035 = vmatpush3.msra.mxu1 %v4809_v25  ;;  %v7880_v25 = vand.u32 4294901760, %v7847_v42  ;;  %v7620_v45 = vand.u32 4294901760, %v5442_v1  ;;  %v3760_v4 = vld [vmem:[%s7538_s1 + $0x148] sm:$0xff] }
  0x65   :  { %4001 = vmatprep.subr.mxu0 %v7876_v34  ;;  %4036 = vmatprep.subr.mxu1 %v4815_v27  ;;  %v3780_v27 = vld [vmem:[%s7538_s1 + $0x1e8] sm:$0xff]  ;;  %v5461_v17 = vsub.f32 %v3781_v19, %v5419_v16  ;;  %v7617_v53 = vand.u32 4294901760, %v5439_v24  ;;  %v7899_v34 = vand.u32 4294901760, %v5194_v57  ;;  %v5540_v19 = vsub.f32 %v3779_v59, %v5476_v54 }
  0x66   :  { %4002 = vmatpush3.msra.mxu0 %v7877_v18  ;;  %4037 = vmatpush3.msra.mxu1 %v4838_v33  ;;  %v5430_v33 = vand.u32 4294901760, %v3764_v20  ;;  %v5447_v60 = vand.u32 4294901760, %v3780_v27  ;;  %v3750_v12 = vld [vmem:[%s7537_s0 + $0x9] ss:$4 sm:$0x3]  ;;  %v5529_v63 = vsub.f32 %v5442_v1, %v7620_v45  ;;  %v7900_v57 = vand.u32 4294901760, %v5198_v52 }
  0x67   :  { %4003 = vmatprep.subr.mxu0 %v7878_v43  ;;  %4038 = vmatprep.subr.mxu1 %v4844_v35  ;;  %v3763_v35 = vld [vmem:[%s7538_s1 + $0x160] sm:$0xff]  ;;  %v3776_v18 = vld [vmem:[%s7538_s1 + $0x1c8] sm:$0xff]  ;;  %v5546_v43 = vsub.f32 %v3762_v55, %v5486_v51  ;;  %v977_v59 = vcombine.low %v3749_v5, %v3750_v12  ;;  %v3774_v12 = vld [vmem:[%s7538_s1 + $0x1b8] sm:$0xff] }
  0x68   :  { %4004 = vmatpush3.msra.mxu0 %v7880_v25  ;;  %4039 = vmatpush3.msra.mxu1 %v4853_v39  ;;  %7883 = vst [vmem:[#allocation6_spill] sm:$0xff] %v5430_v33  ;;  %v7885_v39 = vand.u32 4294901760, %v7855_v41  ;;  %7886 = vst [vmem:[#allocation15_spill] sm:$0xff] %v5447_v60  ;;  %v5467_v42 = vsub.f32 %v3764_v20, %v5430_v33  ;;  %v7893_v41 = vand.u32 4294901760, %v5138_v13  ;;  %v5500_v13 = vand.u32 4294901760, %v3778_v30  ;;  %v7912_v5 = vld [vmem:[#allocation20_spill] sm:$0xff] }
  0x69   :  { %4005 = vmatprep.subr.mxu0 %v7881_v6  ;;  %4040 = vmatprep.subr.mxu1 %v4869_v44  ;;  %v5455_v44 = vand.u32 4294901760, %v3763_v35  ;;  %v5492_v26 = vsub.f32 %v3780_v27, %v5447_v60  ;;  %v5548_v20 = vand.u32 4294901760, %v3777_v47  ;;  %v5551_v6 = vand.u32 4294901760, %v3760_v4  ;;  %v3775_v27 = vld [vmem:[%s7538_s1 + $0x1c0] sm:$0xff] }
  0x6a   :  { %4006 = vmatpush3.msra.mxu0 %v7882_v46  ;;  %4041 = vmatpush3.msra.mxu1 %v7848_v0  ;;  %v7619_v0 = vand.u32 4294901760, %v5428_v50  ;;  %7896 = vst [vmem:[#allocation18_spill] sm:$0xff] %v5500_v13  ;;  %v7614_v11 = vand.u32 4294901760, %v5467_v42  ;;  %v7904_v46 = vand.u32 4294901760, %v5208_v14  ;;  %v7905_v14 = vand.u32 4294901760, %v5215_v31  ;;  %v3771_v31 = vld [vmem:[%s7538_s1 + $0x1a0] sm:$0xff] }
  0x6b   :  { %4007 = vmatprep.subr.mxu0 %v7884_v56  ;;  %4042 = vmatprep.subr.mxu1 %v7850_v9  ;;  %7888 = vst [vmem:[#allocation7_spill] sm:$0xff] %v5455_v44  ;;  %v7891_v9 = vld [vmem:[#allocation9_spill] sm:$0xff]  ;;  %v5498_v3 = vsub.f32 %v3763_v35, %v5455_v44  ;;  %7902 = vst [vmem:[#allocation10_spill] sm:$0xff] %v5548_v20  ;;  %v7616_v25 = vand.u32 4294901760, %v5492_v26  ;;  %v5578_v55 = vand.u32 4294901760, %v3776_v18 }
  0x6c   :  { %4008 = vmatpush3.msra.mxu0 %v7885_v39  ;;  %4043 = vmatpush3.msra.mxu1 %v7852_v29  ;;  %v3761_v29 = vld [vmem:[%s7538_s1 + $0x150] sm:$0xff]  ;;  %7903 = vst [vmem:[#allocation21_spill] sm:$0xff] %v5551_v6  ;;  %v3759_v35 = vld [vmem:[%s7538_s1 + $0x140] sm:$0xff]  ;;  %v5569_v39 = vsub.f32 %v3778_v30, %v5500_v13  ;;  %v7908_v30 = vand.u32 4294901760, %v5221_v37  ;;  %v5605_v37 = vsub.f32 %v3760_v4, %v5551_v6 }
  0x6d   :  { %4009 = vmatprep.subr.mxu0 %v7887_v58  ;;  %4044 = vmatprep.subr.mxu1 %v7891_v9  ;;  %v5517_v10 = vand.u32 4294901760, %v3761_v29  ;;  %v7615_v56 = vand.u32 4294901760, %v5498_v3  ;;  %7907 = vst [vmem:[#allocation12_spill] sm:$0xff] %v5578_v55  ;;  %v7621_v9 = vand.u32 4294901760, %v5540_v19 }
  0x6e   :  { %4010 = vmatpush3.msra.mxu0 %v7889_v15  ;;  %4045 = vmatpush3.msra.mxu1 %v7856_v22  ;;  %v7618_v22 = vand.u32 4294901760, %v5461_v17  ;;  %v5583_v15 = vsub.f32 %v5467_v42, %v7614_v11  ;;  %7913 = vst [vmem:[#allocation14_spill] sm:$0xff] %v5605_v37 }
  0x6f   :  { %4011 = vmatprep.subr.mxu0 %v7890_v21  ;;  %4046 = vmatprep.subr.mxu1 %v7858_v32  ;;  %v5515_v32 = vsub.f32 %v5428_v50, %v7619_v0  ;;  %7898 = vst [vmem:[#allocation19_spill] sm:$0xff] %v5517_v10  ;;  %v5576_v58 = vsub.f32 %v3761_v29, %v5517_v10  ;;  %v5590_v21 = vand.u32 4294901760, %v3775_v27  ;;  %v3758_v29 = vld [vmem:[%s7538_s1 + $0x138] sm:$0xff] }
  0x70   :  { %4012 = vmatpush3.msra.mxu0 %v7893_v41  ;;  %4047 = vmatpush3.msra.mxu1 %v7859_v8  ;;  %v5534_v8 = vsub.f32 %v5439_v24, %v7617_v53  ;;  %v5562_v52 = vsub.f32 %v5461_v17, %v7618_v22  ;;  %v7910_v41 = vld [vmem:[#allocation29_spill] sm:$0xff]  ;;  %v5640_v11 = vand.u32 4294901760, %v3758_v29  ;;  %v7921_v53 = vld [vmem:[#allocation30_spill] sm:$0xff] }
  0x71   :  { %4013 = vmatprep.subr.mxu0 %v7895_v28  ;;  %4048 = vmatprep.subr.mxu1 %v7861_v40  ;;  %v7901_v40 = vld [vmem:[#allocation31_spill] sm:$0xff]  ;;  %7906 = vst [vmem:[#allocation11_spill] sm:$0xff] %v5576_v58  ;;  %7909 = vst [vmem:[#allocation24_spill] sm:$0xff] %v5590_v21  ;;  %v7911_v28 = vand.u32 4294901760, %v7910_v41  ;;  %v7622_v41 = vand.u32 4294901760, %v5569_v39  ;;  %v7924_v22 = vld [vmem:[#allocation25_spill] sm:$0xff] }
  0x72   :  { %4014 = vmatpush3.msra.mxu0 %v7897_v7  ;;  %825 = vmatprep.mubr.f32.mxu0 %v7901_v40  ;;  %v5607_v7 = vand.u32 4294901760, %v3759_v35  ;;  %7920 = vst [vmem:[#allocation5_spill] sm:$0xff] %v5640_v11  ;;  %v5690_v4 = vsub.f32 %v3758_v29, %v5640_v11 }
  0x73   :  { %4015 = vmatprep.subr.mxu0 %v7899_v34  ;;  %4049 = vmatpush3.msra.mxu1 %v7862_v49  ;;  %v5613_v34 = vsub.f32 %v3777_v47, %v5548_v20  ;;  %v5631_v47 = vld [vmem:[%s7538_s1 + $0x1b0] sm:$0xff] }
  0x74   :  { %4016 = vmatpush3.msra.mxu0 %v7900_v57  ;;  %4050 = vmatprep.subr.mxu1 %v5056_v36  ;;  %7914 = vst [vmem:[#allocation16_spill] sm:$0xff] %v5607_v7  ;;  %v3757_v57 = vld [vmem:[%s7538_s1 + $0x130] sm:$0xff]  ;;  %v5665_v45 = vsub.f32 %v3759_v35, %v5607_v7  ;;  %v3755_v35 = vld [vmem:[%s7538_s1 + $0x120] sm:$0xff] }
  0x75   :  { %4017 = vmatprep.subr.mxu0 %v7904_v46  ;;  %4051 = vmatpush3.msra.mxu1 %v5070_v61  ;;  %v5602_v61 = vsub.f32 %v5492_v26, %v7616_v25  ;;  %v7915_v46 = vand.u32 4294901760, %v5254_v2  ;;  %v7918_v2 = vand.u32 4294901760, %v5258_v23  ;;  %v5644_v25 = vsub.f32 %v3776_v18, %v5578_v55  ;;  %v3756_v18 = vld [vmem:[%s7538_s1 + $0x128] sm:$0xff] }
  0x76   :  { %4018 = vmatpush3.msra.mxu0 %v7905_v14  ;;  %4052 = vmatprep.subr.mxu1 %v7912_v5  ;;  %v7916_v14 = vld [vmem:[#allocation22_spill] sm:$0xff]  ;;  %v5651_v23 = vsub.f32 %v5540_v19, %v7621_v9  ;;  %v5668_v9 = vand.u32 4294901760, %v5631_v47 }
  0x77   :  { %4019 = vmatprep.subr.mxu0 %v7908_v30  ;;  %4053 = vmatpush3.msra.mxu1 %v7916_v14  ;;  %v5625_v30 = vsub.f32 %v5498_v3, %v7615_v56  ;;  %v7623_v56 = vand.u32 4294901760, %v5546_v43  ;;  %v1245_v0 = vand.u32 4294901760, %v5602_v61  ;;  %v7926_v36 = vld [vmem:[#allocation26_spill] sm:$0xff]  ;;  %v5680_v61 = vsub.f32 %v3775_v27, %v5590_v21 }
  0x78   :  { %4020 = vmatpush3.msra.mxu0 %v7911_v28  ;;  %v7917_v28 = vld [vmem:[#allocation28_spill] sm:$0xff]  ;;  %7925 = vst [vmem:[#allocation29_spill] sm:$0xff] %v5668_v9  ;;  %v3772_v27 = vld [vmem:[%s7538_s1 + $0x1a8] sm:$0xff]  ;;  %v5701_v14 = vand.u32 4294901760, %v3756_v18  ;;  %929 = vmatprep.mubr.f32.mxu1 %v7901_v40  ;;  %v1252_v29 = vand.u32 4294901760, %v5651_v23  ;;  %v7929_v40 = vand.u32 4294901760, %v5613_v34 }
  0x79   :  { %4021 = vmatprep.subr.mxu0 %v7915_v46  ;;  %v5634_v5 = vrot.slane %v977_v59, %v7917_v28  ;;  %v7919_v46 = vld [vmem:[#allocation23_spill] sm:$0xff]  ;;  %v5653_v59 = vand.u32 4294901760, %v3774_v12  ;;  %v5725_v23 = vand.u32 4294901760, %v3755_v35 }
  0x7a   :  { %4022 = vmatpush3.msra.mxu0 %v7918_v2  ;;  %4054 = vmatprep.subr.mxu1 %v7919_v46  ;;  %v5655_v2 = vand.u32 4294901760, %v3757_v57  ;;  %v7626_v46 = vand.u32 4294901760, %v5576_v58  ;;  %7928 = vst [vmem:[#allocation20_spill] sm:$0xff] %v5701_v14 }
  0x7b   :  { %827 = vmatmul.mubr.f32.vlgmr.msra.gmra.mxu0 %v7921_v53  ;;  %4061 = vmatprep.subr.mxu0 %v5406_v48  ;;  %7922 = vst [vmem:[#allocation9_spill] sm:$0xff] %v5653_v59  ;;  %v985_v49 = vcombine.high %v5634_v5, %v5634_v5  ;;  %7930 = vst [vmem:[#allocation22_spill] sm:$0xff] %v5725_v23 }
  0x7c   :  { %7923 = vst [vmem:[#allocation31_spill] sm:$0xff] %v5655_v2  ;;  %4062 = vmatpush3.msra.mxu0 %v5398_v38  ;;  %4055 = vmatpush3.msra.mxu1 %v7924_v22  ;;  %v5677_v22 = vsub.f32 %v5569_v39, %v7622_v41  ;;  %v5695_v41 = vsub.f32 %v5546_v43, %v7623_v56 }
  0x7d   :  { %4063 = vmatprep.subr.mxu0 %v5419_v16  ;;  %4056 = vmatprep.subr.mxu1 %v7926_v36  ;;  %v7927_v36 = vld [vmem:[#allocation27_spill] sm:$0xff]  ;;  %v5712_v56 = vsub.f32 %v5576_v58, %v7626_v46  ;;  %v7933_v46 = vand.u32 4294901760, %v5515_v32  ;;  %v7936_v32 = vand.u32 4294901760, %v5562_v52  ;;  %v5770_v58 = vsub.f32 %v5631_v47, %v5668_v9 }
  0x7e   :  { %4064 = vmatpush3.msra.mxu0 %v5408_v62  ;;  %4057 = vmatpush3.msra.mxu1 %v7927_v36  ;;  %v5707_v36 = vsub.f32 %v3757_v57, %v5655_v2  ;;  %v5723_v57 = vsub.f32 %v5613_v34, %v7929_v40  ;;  %v7931_v62 = vand.u32 4294901760, %v5529_v63  ;;  %v999_v40 = vrot.slane %v985_v49, %v7917_v28  ;;  %v3754_v49 = vld [vmem:[%s7538_s1 + $0x118] sm:$0xff]  ;;  %v3753_v52 = vld [vmem:[%s7538_s1 + $0x110] sm:$0xff] }
  0x7f   :  { %4065 = vmatprep.subr.mxu0 %v5447_v60  ;;  %931 = vmatmul.mubr.f32.vlgmr.msra.gmra.mxu1 %v7921_v53  ;;  %v5729_v60 = vsub.f32 %v3774_v12, %v5653_v59  ;;  %v5735_v53 = vand.u32 4294901760, %v3772_v27  ;;  %v1147_v12 = vand.u32 4294901760, %v5695_v41  ;;  %v1154_v41 = vand.u32 4294901760, %v5712_v56  ;;  %7938 = vst [vmem:[#allocation25_spill] sm:$0xff] %v5770_v58 }
  0x80   :  { %4066 = vmatpush3.msra.mxu0 %v5430_v33  ;;  %4096 = vmatprep.subr.mxu1 %v7931_v62  ;;  %v1259_v33 = vand.u32 4294901760, %v5677_v22  ;;  %v5749_v62 = vsub.f32 %v3756_v18, %v5701_v14  ;;  %v5751_v22 = vand.u32 4294901760, %v3771_v31  ;;  %v3770_v18 = vld [vmem:[%s7538_s1 + $0x198] sm:$0xff]  ;;  %v992_v56 = vrot.slane %v5634_v5, %v7917_v28 }
  0x81   :  { %4067 = vmatprep.subr.mxu0 %v5476_v54  ;;  %7932 = vst [vmem:[#allocation23_spill] sm:$0xff] %v5735_v53  ;;  %4097 = vmatpush3.msra.mxu1 %v7933_v46  ;;  %v7934_v54 = vand.u32 4294901760, %v5644_v25  ;;  %v7937_v46 = vand.u32 4294901760, %v5605_v37  ;;  %v7940_v47 = vand.u32 4294901760, %v5665_v45  ;;  %v7941_v5 = vand.u32 4294901760, %v5680_v61 }
  0x82   :  { %4068 = vmatpush3.msra.mxu0 %v5455_v44  ;;  %7935 = vst [vmem:[#allocation30_spill] sm:$0xff] %v5749_v62  ;;  %4098 = vmatprep.subr.mxu1 %v7936_v32  ;;  %v7939_v32 = vand.u32 4294901760, %v5534_v8  ;;  %v7947_v28 = vand.u32 4294901760, %v5729_v60 }
  0x83   :  { %v5746_v63 = vsub.f32 %v5644_v25, %v7934_v54  ;;  %4069 = vmatprep.subr.mxu0 %v5500_v13  ;;  %v5763_v54 = vsub.f32 %v5605_v37, %v7937_v46  ;;  %v1266_v46 = vand.u32 4294901760, %v5723_v57  ;;  %v5782_v13 = vsub.f32 %v3755_v35, %v5725_v23  ;;  %v3769_v35 = vld [vmem:[%s7538_s1 + $0x190] sm:$0xff] }
  0x84   :  { %4070 = vmatpush3.msra.mxu0 %v5486_v51  ;;  %4099 = vmatpush3.msra.mxu1 %v7939_v32  ;;  %v5787_v44 = vsub.f32 %v5665_v45, %v7940_v47  ;;  %v5794_v8 = vsub.f32 %v5680_v61, %v7941_v5  ;;  %v5796_v32 = vand.u32 4294901760, %v3754_v49  ;;  %v5802_v57 = vsub.f32 %v3772_v27, %v5735_v53 }
  0x85   :  { %4071 = vmatprep.subr.mxu0 %v5548_v20  ;;  %4100 = vmatprep.subr.mxu1 %v1245_v0  ;;  %v5804_v47 = vand.u32 4294901760, %v999_v40  ;;  %v7943_v0 = vand.u32 4294901760, %v5583_v15  ;;  %v1273_v37 = vand.u32 4294901760, %v5746_v63  ;;  %v5810_v5 = vand.u32 4294901760, %v3770_v18 }
  0x86   :  { %4072 = vmatpush3.msra.mxu0 %v5517_v10  ;;  %v5813_v20 = vand.u32 4294901760, %v3753_v52  ;;  %v1161_v27 = vand.u32 4294901760, %v5763_v54  ;;  %v5819_v10 = vsub.f32 %v3771_v31, %v5751_v22  ;;  %v5821_v15 = vand.u32 4294901760, %v992_v56  ;;  %v3768_v31 = vld [vmem:[%s7538_s1 + $0x188] sm:$0xff] }
  0x87   :  { %7942 = vst [vmem:[#allocation26_spill] sm:$0xff] %v5804_v47  ;;  %4101 = vmatpush3.msra.mxu1 %v7943_v0  ;;  %4073 = vmatprep.subr.mxu0 %v5578_v55  ;;  %v7946_v63 = vand.u32 4294901760, %v5625_v30  ;;  %v1168_v0 = vand.u32 4294901760, %v5787_v44  ;;  %v5830_v55 = vand.u32 4294901760, %v3769_v35  ;;  %v1280_v30 = vand.u32 4294901760, %v5794_v8  ;;  %v3767_v44 = vld [vmem:[%s7538_s1 + $0x180] sm:$0xff] }
  0x88   :  { %4102 = vmatprep.subr.mxu1 %v1252_v29  ;;  %7944 = vst [vmem:[#allocation27_spill] sm:$0xff] %v5819_v10  ;;  %7945 = vst [vmem:[#allocation32_spill] sm:$0xff] %v5821_v15  ;;  %4074 = vmatpush3.msra.mxu0 %v5551_v6  ;;  %v1286_v29 = vsub.f32 %v5729_v60, %v7947_v28  ;;  %v3752_v28 = vld [vmem:[%s7538_s1 + $0x108] sm:$0xff]  ;;  %v5846_v54 = vsub.f32 %v999_v40, %v5804_v47  ;;  %v7948_v51 = vand.u32 4294901760, %v5690_v4 }
  0x89   :  { %4103 = vmatpush3.msra.mxu1 %v7946_v63  ;;  %4075 = vmatprep.subr.mxu0 %v5590_v21  ;;  %v5839_v63 = vsub.f32 %v3754_v49, %v5796_v32  ;;  %v5853_v8 = vsub.f32 %v3753_v52, %v5813_v20  ;;  %v5860_v21 = vsub.f32 %v3770_v18, %v5810_v5  ;;  %v7949_v40 = vand.u32 4294901760, %v5770_v58  ;;  %v3751_v49 = vld [vmem:[%s7538_s1 + $0x100] sm:$0xff] }
  0x8a   :  { %4104 = vmatprep.subr.mxu1 %v1259_v33  ;;  %4076 = vmatpush3.msra.mxu0 %v5607_v7  ;;  %v1174_v33 = vsub.f32 %v5690_v4, %v7948_v51  ;;  %v5866_v51 = vand.u32 4294901760, %v3768_v31  ;;  %v5873_v7 = vsub.f32 %v992_v56, %v5821_v15  ;;  %v1287_v18 = vand.u32 4294901760, %v1286_v29 }
  0x8b   :  { %4105 = vmatpush3.msra.mxu1 %v1147_v12  ;;  %4077 = vmatprep.subr.mxu0 %v5653_v59  ;;  %v1293_v12 = vsub.f32 %v5770_v58, %v7949_v40  ;;  %v5879_v40 = vand.u32 4294901760, %v3752_v28  ;;  %v7951_v52 = vand.u32 4294901760, %v5802_v57  ;;  %v5886_v58 = vand.u32 4294901760, %v3767_v44 }
  0x8c   :  { %4106 = vmatprep.subr.mxu1 %v1266_v46  ;;  %4078 = vmatpush3.msra.mxu0 %v5640_v11  ;;  %v7950_v46 = vand.u32 4294901760, %v5707_v36  ;;  %v5890_v29 = vsub.f32 %v3769_v35, %v5830_v55  ;;  %v7952_v6 = vand.u32 4294901760, %v5749_v62  ;;  %v7954_v11 = vand.u32 4294901760, %v5782_v13 }
  0x8d   :  { %4107 = vmatpush3.msra.mxu1 %v1154_v41  ;;  %4079 = vmatprep.subr.mxu0 %v5668_v9  ;;  %v1300_v56 = vsub.f32 %v5802_v57, %v7951_v52  ;;  %v1294_v52 = vand.u32 4294901760, %v1293_v12  ;;  %v7953_v41 = vand.u32 4294901760, %v5819_v10  ;;  %v7957_v12 = vand.u32 4294901760, %v5860_v21 }
  0x8e   :  { %v1181_v59 = vsub.f32 %v5707_v36, %v7950_v46  ;;  %4108 = vmatprep.subr.mxu1 %v1273_v37  ;;  %4080 = vmatpush3.msra.mxu0 %v5655_v2  ;;  %v1175_v46 = vand.u32 4294901760, %v1174_v33  ;;  %v1188_v9 = vsub.f32 %v5749_v62, %v7952_v6  ;;  %v5896_v37 = vand.u32 4294901760, %v3751_v49 }
  0x8f   :  { %4109 = vmatpush3.msra.mxu1 %v1161_v27  ;;  %4081 = vmatprep.subr.mxu0 %v5735_v53  ;;  %v1307_v35 = vsub.f32 %v5819_v10, %v7953_v41  ;;  %v5905_v27 = vsub.f32 %v3768_v31, %v5866_v51  ;;  %v5909_v33 = vsub.f32 %v3752_v28, %v5879_v40  ;;  %v1301_v41 = vand.u32 4294901760, %v1300_v56 }
  0x90   :  { %4110 = vmatprep.subr.mxu1 %v1280_v30  ;;  %4082 = vmatpush3.msra.mxu0 %v5701_v14  ;;  %v1182_v6 = vand.u32 4294901760, %v1181_v59  ;;  %v1195_v30 = vsub.f32 %v5782_v13, %v7954_v11  ;;  %v7955_v31 = vand.u32 4294901760, %v5846_v54  ;;  %v5921_v59 = vsub.f32 %v3767_v44, %v5886_v58 }
  0x91   :  { %4111 = vmatpush3.msra.mxu1 %v1168_v0  ;;  %4083 = vmatprep.subr.mxu0 %v5751_v22  ;;  %v1189_v28 = vand.u32 4294901760, %v1188_v9  ;;  %v5925_v11 = vsub.f32 %v3751_v49, %v5896_v37  ;;  %v7958_v44 = vand.u32 4294901760, %v5873_v7  ;;  %v7959_v49 = vand.u32 4294901760, %v5839_v63 }
  0x92   :  { %4112 = vmatprep.subr.mxu1 %v1287_v18  ;;  %v1101_v2 = vsub.f32 %v5846_v54, %v7955_v31  ;;  %4084 = vmatpush3.msra.mxu0 %v5725_v23  ;;  %v1314_v18 = vsub.f32 %v5860_v21, %v7957_v12  ;;  %v1308_v31 = vand.u32 4294901760, %v1307_v35  ;;  %v1196_v9 = vand.u32 4294901760, %v1195_v30 }
  0x93   :  { %4113 = vmatpush3.msra.mxu1 %v1175_v46  ;;  %7956 = vst [vmem:[#allocation33_spill] sm:$0xff] %v5925_v11  ;;  %4085 = vmatprep.subr.mxu0 %v5810_v5  ;;  %v1107_v0 = vsub.f32 %v5873_v7, %v7958_v44  ;;  %v1202_v12 = vsub.f32 %v5839_v63, %v7959_v49  ;;  %v7960_v35 = vand.u32 4294901760, %v5890_v29  ;;  %v7961_v30 = vand.u32 4294901760, %v5853_v8 }
  0x94   :  { %4114 = vmatprep.subr.mxu1 %v1294_v52  ;;  %4086 = vmatpush3.msra.mxu0 %v5796_v32  ;;  %v1102_v52 = vand.u32 4294901760, %v1101_v2  ;;  %v7964_v56 = vand.u32 4294901760, %v5921_v59 }
  0x95   :  { %4115 = vmatpush3.msra.mxu1 %v1182_v6  ;;  %4087 = vmatprep.subr.mxu0 %v5830_v55  ;;  %v1321_v44 = vsub.f32 %v5890_v29, %v7960_v35  ;;  %v1315_v6 = vand.u32 4294901760, %v1314_v18  ;;  %v1209_v49 = vsub.f32 %v5853_v8, %v7961_v30  ;;  %v1108_v2 = vand.u32 4294901760, %v1107_v0 }
  0x96   :  { %4116 = vmatprep.subr.mxu1 %v1301_v41  ;;  %4088 = vmatpush3.msra.mxu0 %v5813_v20  ;;  %v7962_v41 = vand.u32 4294901760, %v5905_v27  ;;  %v1203_v46 = vand.u32 4294901760, %v1202_v12  ;;  %v1335_v0 = vsub.f32 %v5921_v59, %v7964_v56 }
  0x97   :  { %4117 = vmatpush3.msra.mxu1 %v1189_v28  ;;  %4089 = vmatprep.subr.mxu0 %v5866_v51  ;;  %v7963_v28 = vand.u32 4294901760, %v5909_v33  ;;  %v1322_v30 = vand.u32 4294901760, %v1321_v44 }
  0x98   :  { %4118 = vmatprep.subr.mxu1 %v1308_v31  ;;  %v1328_v35 = vsub.f32 %v5905_v27, %v7962_v41  ;;  %4090 = vmatpush3.msra.mxu0 %v5879_v40  ;;  %v1210_v31 = vand.u32 4294901760, %v1209_v49  ;;  %v7965_v41 = vand.u32 4294901760, %v5925_v11  ;;  %v1336_v56 = vand.u32 4294901760, %v1335_v0  ;;  %v7968_v49 = vld [vmem:[#allocation15_spill] sm:$0xff]  ;;  %v7974_v0 = vld [vmem:[#allocation8_spill] sm:$0xff] }
  0x99   :  { %4119 = vmatpush3.msra.mxu1 %v1196_v9  ;;  %v1216_v18 = vsub.f32 %v5909_v33, %v7963_v28  ;;  %4091 = vmatprep.subr.mxu0 %v5886_v58  ;;  %v7971_v28 = vld [vmem:[#allocation17_spill] sm:$0xff] }
  0x9a   :  { %1103 = vmatprep.mubr.f32.mxu0 %v1102_v52  ;;  %4092 = vmatpush3.msra.mxu0 %v5896_v37  ;;  %v1223_v9 = vsub.f32 %v5925_v11, %v7965_v41  ;;  %v1329_v12 = vand.u32 4294901760, %v1328_v35  ;;  %v7970_v35 = vld [vmem:[#allocation6_spill] sm:$0xff] }
  0x9b   :  { %4120 = vmatprep.subr.mxu1 %v1315_v6  ;;  %4131 = vmatprep.subr.mxu0 %v5442_v1  ;;  %v1217_v52 = vand.u32 4294901760, %v1216_v18  ;;  %v7967_v6 = vld [vmem:[#allocation13_spill] sm:$0xff]  ;;  %v7972_v18 = vld [vmem:[#allocation7_spill] sm:$0xff]  ;;  %v7976_v41 = vld [vmem:[#allocation10_spill] sm:$0xff] }
  0x9c   :  { %1109 = vmatmul.mubr.f32.vlgmr.msra.gmra.mxu0 %v1108_v2  ;;  %4121 = vmatpush3.msra.mxu1 %v1203_v46  ;;  %v1224_v44 = vand.u32 4294901760, %v1223_v9  ;;  %v7966_v46 = vld [vmem:[#allocation11_spill] sm:$0xff]  ;;  %v7969_v2 = vld [vmem:[#allocation14_spill] sm:$0xff] }
  0x9d   :  { %4132 = vmatpush3.msra.mxu0 %v5428_v50  ;;  %4122 = vmatprep.subr.mxu1 %v1322_v30  ;;  %v7973_v30 = vld [vmem:[#allocation18_spill] sm:$0xff]  ;;  %v7977_v9 = vld [vmem:[#allocation19_spill] sm:$0xff] }
  0x9e   :  { %4133 = vmatprep.subr.mxu0 %v5461_v17  ;;  %4123 = vmatpush3.msra.mxu1 %v1210_v31  ;;  %v7975_v31 = vld [vmem:[#allocation25_spill] sm:$0xff] }
  0x9f   :  { %4134 = vmatpush3.msra.mxu0 %v5439_v24  ;;  %4124 = vmatprep.subr.mxu1 %v1329_v12  ;;  %v7978_v12 = vld [vmem:[#allocation12_spill] sm:$0xff] }
  0xa0   :  { %4135 = vmatprep.subr.mxu0 %v5492_v26  ;;  %4125 = vmatpush3.msra.mxu1 %v1217_v52  ;;  %v7979_v52 = vld [vmem:[#allocation21_spill] sm:$0xff] }
  0xa1   :  { %4136 = vmatpush3.msra.mxu0 %v5467_v42  ;;  %4126 = vmatprep.subr.mxu1 %v1336_v56  ;;  %v7980_v56 = vld [vmem:[#allocation24_spill] sm:$0xff] }
  0xa2   :  { %4137 = vmatprep.subr.mxu0 %v5540_v19  ;;  %4127 = vmatpush3.msra.mxu1 %v1224_v44  ;;  %v7981_v44 = vld [vmem:[#allocation16_spill] sm:$0xff] }
  0xa3   :  { %1339 = vmatprep.mubr.f32.mxu1 %v5804_v47  ;;  %4138 = vmatpush3.msra.mxu0 %v5498_v3  ;;  %v7983_v47 = vld [vmem:[#allocation5_spill] sm:$0xff] }
  0xa4   :  { %1341 = vmatmul.mubr.f32.vlgmr.msra.gmra.mxu1 %v5821_v15  ;;  %4139 = vmatprep.subr.mxu0 %v5569_v39  ;;  %v7982_v15 = vld [vmem:[#allocation9_spill] sm:$0xff] }
  0xa5   :  { %4166 = vmatprep.subr.mxu1 %v5406_v48  ;;  %4140 = vmatpush3.msra.mxu0 %v5546_v43 }
  0xa6   :  { %4167 = vmatpush3.msra.mxu1 %v5398_v38  ;;  %4141 = vmatprep.subr.mxu0 %v5613_v34 }
  0xa7   :  { %4168 = vmatprep.subr.mxu1 %v5419_v16  ;;  %4142 = vmatpush3.msra.mxu0 %v7966_v46 }
  0xa8   :  { %4169 = vmatpush3.msra.mxu1 %v7967_v6  ;;  %4143 = vmatprep.subr.mxu0 %v5644_v25 }
  0xa9   :  { %4170 = vmatprep.subr.mxu1 %v7968_v49  ;;  %4144 = vmatpush3.msra.mxu0 %v7969_v2 }
  0xaa   :  { %4171 = vmatpush3.msra.mxu1 %v7970_v35  ;;  %4145 = vmatprep.subr.mxu0 %v5680_v61 }
  0xab   :  { %4172 = vmatprep.subr.mxu1 %v7971_v28  ;;  %4146 = vmatpush3.msra.mxu0 %v5665_v45 }
  0xac   :  { %4173 = vmatpush3.msra.mxu1 %v7972_v18  ;;  %4147 = vmatprep.subr.mxu0 %v5729_v60 }
  0xad   :  { %4174 = vmatprep.subr.mxu1 %v7973_v30  ;;  %4148 = vmatpush3.msra.mxu0 %v5690_v4 }
  0xae   :  { %4175 = vmatpush3.msra.mxu1 %v7974_v0  ;;  %4149 = vmatprep.subr.mxu0 %v7975_v31 }
  0xaf   :  { %4176 = vmatprep.subr.mxu1 %v7976_v41  ;;  %4150 = vmatpush3.msra.mxu0 %v5707_v36 }
  0xb0   :  { %4177 = vmatpush3.msra.mxu1 %v7977_v9  ;;  %4151 = vmatprep.subr.mxu0 %v5802_v57 }
  0xb1   :  { %4178 = vmatprep.subr.mxu1 %v7978_v12  ;;  %4152 = vmatpush3.msra.mxu0 %v5749_v62  ;;  %v7984_v62 = vld [vmem:[#allocation29_spill] sm:$0xff] }
  0xb2   :  { %4179 = vmatpush3.msra.mxu1 %v7979_v52  ;;  %4153 = vmatprep.subr.mxu0 %v5819_v10  ;;  %v7985_v10 = vld [vmem:[#allocation31_spill] sm:$0xff] }
  0xb3   :  { %4180 = vmatprep.subr.mxu1 %v7980_v56  ;;  %4154 = vmatpush3.msra.mxu0 %v5782_v13 }
  0xb4   :  { %4181 = vmatpush3.msra.mxu1 %v7981_v44  ;;  %4155 = vmatprep.subr.mxu0 %v5860_v21 }
  0xb5   :  { %4182 = vmatprep.subr.mxu1 %v7982_v15  ;;  %4156 = vmatpush3.msra.mxu0 %v5839_v63 }
  0xb6   :  { %4183 = vmatpush3.msra.mxu1 %v7983_v47  ;;  %4157 = vmatprep.subr.mxu0 %v5890_v29 }
  0xb7   :  { %4184 = vmatprep.subr.mxu1 %v7984_v62  ;;  %4158 = vmatpush3.msra.mxu0 %v5853_v8 }
  0xb8   :  { %4185 = vmatpush3.msra.mxu1 %v7985_v10  ;;  %4159 = vmatprep.subr.mxu0 %v5905_v27 }
  0xb9   :  { %4186 = vmatprep.subr.mxu1 %v5735_v53  ;;  %4160 = vmatpush3.msra.mxu0 %v5909_v33  ;;  %v7986_v53 = vand.u32 4294901760, %v5442_v1  ;;  %v7990_v1 = vand.u32 4294901760, %v5492_v26  ;;  %v7995_v26 = vand.u32 4294901760, %v5873_v7 }
  0xba   :  { %4187 = vmatpush3.msra.mxu1 %v5701_v14  ;;  %4161 = vmatprep.subr.mxu0 %v5921_v59  ;;  %v7987_v14 = vand.u32 4294901760, %v5428_v50  ;;  %v7991_v50 = vand.u32 4294901760, %v5467_v42  ;;  %v7997_v42 = vand.u32 4294901760, %v5546_v43  ;;  %v3815_v43 = vld [vmem:[%s7538_s1 + $0x2f0] sm:$0xff] }
  0xbb   :  { %4188 = vmatprep.subr.mxu1 %v5751_v22  ;;  %4162 = vmatpush3.msra.mxu0 %v5925_v11  ;;  %v7988_v11 = vand.u32 4294901760, %v5461_v17  ;;  %v7992_v17 = vand.u32 4294901760, %v5540_v19  ;;  %v7998_v19 = vand.u32 4294901760, %v5613_v34  ;;  %v3799_v34 = vld [vmem:[%s7538_s1 + $0x270] sm:$0xff] }
  0xbc   :  { %1476 = vmatprep.mubr.f32.mxu0 %v5846_v54  ;;  %4189 = vmatpush3.msra.mxu1 %v5725_v23  ;;  %v7989_v23 = vand.u32 4294901760, %v5439_v24  ;;  %v7993_v24 = vand.u32 4294901760, %v5846_v54  ;;  %v3814_v54 = vld [vmem:[%s7538_s1 + $0x2e8] sm:$0xff] }
  0xbd   :  { %1479 = vmatmul.mubr.f32.vlgmr.msra.gmra.mxu0 %v5873_v7  ;;  %4190 = vmatprep.subr.mxu1 %v5810_v5  ;;  %v8002_v7 = vand.u32 4294901760, %v5680_v61  ;;  %v8004_v61 = vand.u32 4294901760, %v5729_v60  ;;  %v8007_v60 = vand.u32 4294901760, %v7975_v31  ;;  %v3797_v31 = vld [vmem:[%s7538_s1 + $0x260] sm:$0xff] }
  0xbe   :  { %4201 = vmatprep.subr.mxu0 %v7986_v53  ;;  %4191 = vmatpush3.msra.mxu1 %v5796_v32  ;;  %v8003_v53 = vand.u32 4294901760, %v5665_v45  ;;  %v6106_v45 = vand.u32 4294901760, %v3799_v34 }
  0xbf   :  { %4202 = vmatpush3.msra.mxu0 %v7987_v14  ;;  %4192 = vmatprep.subr.mxu1 %v5830_v55  ;;  %v7994_v14 = vand.u32 4294901760, %v5498_v3  ;;  %v7999_v3 = vand.u32 4294901760, %v7966_v46  ;;  %v6101_v46 = vand.u32 4294901760, %v3815_v43 }
  0xc0   :  { %4203 = vmatprep.subr.mxu0 %v7988_v11  ;;  %4193 = vmatpush3.msra.mxu1 %v5813_v20  ;;  %8006 = vst [vmem:[#allocation11_spill] sm:$0xff] %v6106_v45 }
  0xc1   :  { %4204 = vmatpush3.msra.mxu0 %v7989_v23  ;;  %4194 = vmatprep.subr.mxu1 %v5866_v51  ;;  %v7996_v23 = vand.u32 4294901760, %v5569_v39  ;;  %v3816_v39 = vld [vmem:[%s7538_s1 + $0x2f8] sm:$0xff] }
  0xc2   :  { %4205 = vmatprep.subr.mxu0 %v7990_v1  ;;  %4195 = vmatpush3.msra.mxu1 %v5879_v40 }
  0xc3   :  { %4206 = vmatpush3.msra.mxu0 %v7991_v50  ;;  %4196 = vmatprep.subr.mxu1 %v5886_v58  ;;  %v8015_v50 = vld [vmem:[#allocation27_spill] sm:$0xff] }
  0xc4   :  { %4207 = vmatprep.subr.mxu0 %v7992_v17  ;;  %4197 = vmatpush3.msra.mxu1 %v5896_v37  ;;  %v8016_v17 = vand.u32 4294901760, %v8015_v50 }
  0xc5   :  { %1583 = vmatprep.mubr.f32.mxu1 %v7993_v24  ;;  %4208 = vmatpush3.msra.mxu0 %v7994_v14  ;;  %v3796_v14 = vld [vmem:[%s7538_s1 + $0x258] sm:$0xff] }
  0xc6   :  { %1587 = vmatmul.mubr.f32.vlgmr.msra.gmra.mxu1 %v7995_v26  ;;  %4209 = vmatprep.subr.mxu0 %v7996_v23  ;;  %v6163_v23 = vand.u32 4294901760, %v3797_v31 }
  0xc7   :  { %4236 = vmatprep.subr.mxu1 %v5406_v48  ;;  %4210 = vmatpush3.msra.mxu0 %v7997_v42  ;;  %v8000_v48 = vand.u32 4294901760, %v5644_v25  ;;  %v6085_v25 = vand.u32 4294901760, %v3816_v39 }
  0xc8   :  { %4237 = vmatpush3.msra.mxu1 %v5398_v38  ;;  %4211 = vmatprep.subr.mxu0 %v7998_v19  ;;  %v8001_v38 = vand.u32 4294901760, %v7969_v2  ;;  %v6114_v2 = vand.u32 4294901760, %v3814_v54  ;;  %8018 = vst [vmem:[#allocation6_spill] sm:$0xff] %v6163_v23  ;;  %v3795_v19 = vld [vmem:[%s7538_s1 + $0x250] sm:$0xff] }
  0xc9   :  { %4238 = vmatprep.subr.mxu1 %v5419_v16  ;;  %4212 = vmatpush3.msra.mxu0 %v7999_v3  ;;  %v3800_v16 = vld [vmem:[%s7538_s1 + $0x278] sm:$0xff]  ;;  %v8020_v3 = vand.u32 4294901760, %v5860_v21  ;;  %v3810_v21 = vld [vmem:[%s7538_s1 + $0x2c8] sm:$0xff] }
  0xca   :  { %4239 = vmatpush3.msra.mxu1 %v7967_v6  ;;  %4213 = vmatprep.subr.mxu0 %v8000_v48  ;;  %v6099_v11 = vand.u32 4294901760, %v3800_v16  ;;  %v8005_v6 = vand.u32 4294901760, %v5690_v4  ;;  %8008 = vst [vmem:[#allocation13_spill] sm:$0xff] %v6114_v2  ;;  %v3813_v4 = vld [vmem:[%s7538_s1 + $0x2e0] sm:$0xff]  ;;  %v6158_v26 = vsub.f32 %v3814_v54, %v6114_v2  ;;  %v8021_v48 = vand.u32 4294901760, %v5839_v63 }
  0xcb   :  { %4240 = vmatprep.subr.mxu1 %v7968_v49  ;;  %4214 = vmatpush3.msra.mxu0 %v8001_v38  ;;  %v3798_v49 = vld [vmem:[%s7538_s1 + $0x268] sm:$0xff]  ;;  %v6148_v1 = vand.u32 4294901760, %v3813_v4  ;;  %v6184_v38 = vand.u32 4294901760, %v3796_v14  ;;  %v3783_v54 = vld [vmem:[%s7537_s0 + $0x2] ss:$4 sm:$0x3] }
  0xcc   :  { %4241 = vmatpush3.msra.mxu1 %v7970_v35  ;;  %4215 = vmatprep.subr.mxu0 %v8002_v7  ;;  %v6120_v35 = vsub.f32 %v3816_v39, %v6085_v25  ;;  %v6203_v7 = vand.u32 4294901760, %v3795_v19 }
  0xcd   :  { %4242 = vmatprep.subr.mxu1 %v7971_v28  ;;  %4216 = vmatpush3.msra.mxu0 %v8003_v53  ;;  %v8009_v28 = vand.u32 4294901760, %v5707_v36  ;;  %v3812_v36 = vld [vmem:[%s7538_s1 + $0x2d8] sm:$0xff]  ;;  %8014 = vst [vmem:[#allocation14_spill] sm:$0xff] %v6148_v1  ;;  %8022 = vst [vmem:[#allocation7_spill] sm:$0xff] %v6184_v38  ;;  %v8026_v53 = vand.u32 4294901760, %v5853_v8 }
  0xce   :  { %4243 = vmatpush3.msra.mxu1 %v7972_v18  ;;  %4217 = vmatprep.subr.mxu0 %v8004_v61  ;;  %v8010_v18 = vand.u32 4294901760, %v5802_v57  ;;  %v8012_v57 = vld [vmem:[#allocation30_spill] sm:$0xff]  ;;  %v7682_v24 = vand.u32 4294901760, %v6120_v35  ;;  %v6165_v42 = vand.u32 4294901760, %v3812_v36  ;;  %8025 = vst [vmem:[#allocation8_spill] sm:$0xff] %v6203_v7  ;;  %v8028_v8 = vld [vmem:[#allocation23_spill] sm:$0xff]  ;;  %v6257_v50 = vsub.f32 %v3795_v19, %v6203_v7 }
  0xcf   :  { %4244 = vmatprep.subr.mxu1 %v7973_v30  ;;  %4218 = vmatpush3.msra.mxu0 %v8005_v6  ;;  %v6129_v30 = vsub.f32 %v3800_v16, %v6099_v11  ;;  %v3784_v61 = vld [vmem:[%s7537_s0 + $0xa] ss:$4 sm:$0x3]  ;;  %v8027_v6 = vand.u32 4294901760, %v5905_v27 }
  0xd0   :  { %4245 = vmatpush3.msra.mxu1 %v7974_v0  ;;  %4219 = vmatprep.subr.mxu0 %v8007_v60  ;;  %v6131_v0 = vand.u32 4294901760, %v3798_v49  ;;  %8019 = vst [vmem:[#allocation17_spill] sm:$0xff] %v6165_v42  ;;  %v6234_v60 = vand.u32 4294901760, %v3810_v21 }
  0xd1   :  { %4246 = vmatprep.subr.mxu1 %v7976_v41  ;;  %4220 = vmatpush3.msra.mxu0 %v8009_v28  ;;  %v6140_v41 = vsub.f32 %v3815_v43, %v6101_v46  ;;  %v8023_v43 = vand.u32 4294901760, %v5890_v29  ;;  %v6210_v29 = vsub.f32 %v3797_v31, %v6163_v23  ;;  %v8030_v28 = vand.u32 4294901760, %v5909_v33 }
  0xd2   :  { %4247 = vmatpush3.msra.mxu1 %v7977_v9  ;;  %4221 = vmatprep.subr.mxu0 %v8010_v18  ;;  %8011 = vst [vmem:[#allocation15_spill] sm:$0xff] %v6131_v0  ;;  %v8013_v9 = vand.u32 4294901760, %v8012_v57  ;;  %8029 = vst [vmem:[#allocation25_spill] sm:$0xff] %v6234_v60  ;;  %v8031_v18 = vld [vmem:[#allocation20_spill] sm:$0xff]  ;;  %v6244_v31 = vsub.f32 %v3796_v14, %v6184_v38 }
  0xd3   :  { %4248 = vmatprep.subr.mxu1 %v7978_v12  ;;  %v6146_v12 = vsub.f32 %v3799_v34, %v6106_v45  ;;  %v7680_v39 = vand.u32 4294901760, %v6140_v41  ;;  %v7678_v34 = vand.u32 4294901760, %v6158_v26  ;;  %v3793_v14 = vld [vmem:[%s7538_s1 + $0x240] sm:$0xff] }
  0xd4   :  { %4222 = vmatpush3.msra.mxu0 %v8013_v9  ;;  %4249 = vmatpush3.msra.mxu1 %v7979_v52  ;;  %v8017_v52 = vand.u32 4294901760, %v5782_v13  ;;  %v6177_v13 = vsub.f32 %v3798_v49, %v6131_v0  ;;  %v8032_v9 = vand.u32 4294901760, %v5921_v59  ;;  %v1909_v59 = vcombine.low %v3783_v54, %v3784_v61  ;;  %v3790_v54 = vld [vmem:[%s7538_s1 + $0x228] sm:$0xff] }
  0xd5   :  { %4223 = vmatprep.subr.mxu0 %v8016_v17  ;;  %4250 = vmatprep.subr.mxu1 %v7980_v56  ;;  %v3811_v56 = vld [vmem:[%s7538_s1 + $0x2d0] sm:$0xff]  ;;  %v7679_v16 = vand.u32 4294901760, %v6146_v12  ;;  %v6232_v49 = vsub.f32 %v6140_v41, %v7680_v39  ;;  %v3809_v17 = vld [vmem:[%s7538_s1 + $0x2c0] sm:$0xff]  ;;  %v6274_v19 = vsub.f32 %v6158_v26, %v7678_v34  ;;  %v7687_v34 = vand.u32 4294901760, %v6257_v50 }
  0xd6   :  { %4224 = vmatpush3.msra.mxu0 %v8017_v52  ;;  %4251 = vmatpush3.msra.mxu1 %v7981_v44  ;;  %v7681_v44 = vand.u32 4294901760, %v6129_v30  ;;  %v6201_v63 = vand.u32 4294901760, %v3811_v56  ;;  %v7676_v27 = vand.u32 4294901760, %v6177_v13 }
  0xd7   :  { %4225 = vmatprep.subr.mxu0 %v8020_v3  ;;  %4252 = vmatprep.subr.mxu1 %v7982_v15  ;;  %v6191_v15 = vsub.f32 %v3813_v4, %v6148_v1  ;;  %v3794_v4 = vld [vmem:[%s7538_s1 + $0x248] sm:$0xff] }
  0xd8   :  { %4226 = vmatpush3.msra.mxu0 %v8021_v48  ;;  %4253 = vmatpush3.msra.mxu1 %v7983_v47  ;;  %v6199_v47 = vsub.f32 %v6120_v35, %v7682_v24  ;;  %8024 = vst [vmem:[#allocation18_spill] sm:$0xff] %v6201_v63  ;;  %v6266_v52 = vsub.f32 %v3811_v56, %v6201_v63  ;;  %v8033_v3 = vld [vmem:[#allocation33_spill] sm:$0xff]  ;;  %v8038_v56 = vld [vmem:[#allocation32_spill] sm:$0xff] }
  0xd9   :  { %4227 = vmatprep.subr.mxu0 %v8023_v43  ;;  %4254 = vmatprep.subr.mxu1 %v7984_v62  ;;  %v6213_v62 = vsub.f32 %v3812_v36, %v6165_v42  ;;  %v6249_v36 = vsub.f32 %v6146_v12, %v7679_v16  ;;  %v7677_v57 = vand.u32 4294901760, %v6191_v15  ;;  %v8034_v48 = vand.u32 4294901760, %v8033_v3  ;;  %v8042_v16 = vld [vmem:[#allocation28_spill] sm:$0xff] }
  0xda   :  { %4228 = vmatpush3.msra.mxu0 %v8026_v53  ;;  %4255 = vmatpush3.msra.mxu1 %v7985_v10  ;;  %v6227_v10 = vsub.f32 %v6129_v30, %v7681_v44  ;;  %v6276_v43 = vand.u32 4294901760, %v3794_v4  ;;  %v7683_v53 = vand.u32 4294901760, %v6210_v29  ;;  %v6316_v39 = vrot.slane %v1909_v59, %v8042_v16 }
  0xdb   :  { %4229 = vmatprep.subr.mxu0 %v8027_v6  ;;  %4256 = vmatprep.subr.mxu1 %v8028_v8  ;;  %v7684_v6 = vand.u32 4294901760, %v6213_v62  ;;  %v8037_v8 = vld [vmem:[#allocation22_spill] sm:$0xff]  ;;  %v6299_v3 = vsub.f32 %v6191_v15, %v7677_v57  ;;  %v7686_v57 = vand.u32 4294901760, %v6266_v52 }
  0xdc   :  { %4230 = vmatpush3.msra.mxu0 %v8030_v28  ;;  %4257 = vmatpush3.msra.mxu1 %v8031_v18  ;;  %8036 = vst [vmem:[#allocation10_spill] sm:$0xff] %v6276_v43  ;;  %v6287_v28 = vsub.f32 %v6177_v13, %v7676_v27  ;;  %v6290_v18 = vsub.f32 %v3810_v21, %v6234_v60  ;;  %v3792_v21 = vld [vmem:[%s7538_s1 + $0x238] sm:$0xff] }
  0xdd   :  { %4231 = vmatprep.subr.mxu0 %v8032_v9  ;;  %4258 = vmatprep.subr.mxu1 %v5751_v22  ;;  %v8035_v22 = vld [vmem:[#allocation26_spill] sm:$0xff]  ;;  %v6294_v9 = vand.u32 4294901760, %v3809_v17  ;;  %v6322_v24 = vsub.f32 %v3794_v4, %v6276_v43  ;;  %v6332_v27 = vsub.f32 %v6213_v62, %v7684_v6  ;;  %v6342_v44 = vand.u32 4294901760, %v3792_v21 }
  0xde   :  { %4232 = vmatpush3.msra.mxu0 %v8034_v48  ;;  %1753 = vmatprep.mubr.f32.mxu0 %v8035_v22  ;;  %8039 = vst [vmem:[#allocation19_spill] sm:$0xff] %v6290_v18  ;;  %v6301_v48 = vand.u32 4294901760, %v3793_v14 }
  0xdf   :  { %4259 = vmatpush3.msra.mxu1 %v8037_v8  ;;  %1755 = vmatmul.mubr.f32.vlgmr.msra.gmra.mxu0 %v8038_v56  ;;  %8040 = vst [vmem:[#allocation12_spill] sm:$0xff] %v6294_v9  ;;  %v3808_v8 = vld [vmem:[%s7538_s1 + $0x2b8] sm:$0xff]  ;;  %8043 = vst [vmem:[#allocation24_spill] sm:$0xff] %v6322_v24  ;;  %v6363_v33 = vsub.f32 %v3809_v17, %v6294_v9  ;;  %v3806_v17 = vld [vmem:[%s7538_s1 + $0x2a8] sm:$0xff] }
  0xe0   :  { %4260 = vmatprep.subr.mxu1 %v5810_v5  ;;  %4271 = vmatprep.subr.mxu0 %v6085_v25  ;;  %8041 = vst [vmem:[#allocation21_spill] sm:$0xff] %v6301_v48  ;;  %v7685_v5 = vand.u32 4294901760, %v6244_v31  ;;  %v6340_v59 = vand.u32 4294901760, %v3808_v8  ;;  %8045 = vst [vmem:[#allocation9_spill] sm:$0xff] %v6342_v44  ;;  %v6352_v61 = vsub.f32 %v3793_v14, %v6301_v48 }
  0xe1   :  { %4261 = vmatpush3.msra.mxu1 %v5796_v32  ;;  %4272 = vmatpush3.msra.mxu0 %v6099_v11  ;;  %v6327_v32 = vsub.f32 %v6210_v29, %v7683_v53  ;;  %v3807_v53 = vld [vmem:[%s7538_s1 + $0x2b0] sm:$0xff] }
  0xe2   :  { %4262 = vmatprep.subr.mxu1 %v5830_v55  ;;  %4273 = vmatprep.subr.mxu0 %v6101_v46  ;;  %v3791_v55 = vld [vmem:[%s7538_s1 + $0x230] sm:$0xff]  ;;  %8044 = vst [vmem:[#allocation16_spill] sm:$0xff] %v6340_v59  ;;  %v6357_v4 = vsub.f32 %v6244_v31, %v7685_v5  ;;  %v6377_v5 = vsub.f32 %v6257_v50, %v7687_v34  ;;  %v6388_v6 = vand.u32 4294901760, %v3807_v53  ;;  %v8053_v34 = vand.u32 4294901760, %v6227_v10 }
  0xe3   :  { %4263 = vmatpush3.msra.mxu1 %v5813_v20  ;;  %4274 = vmatpush3.msra.mxu0 %v6106_v45  ;;  %v6372_v14 = vand.u32 4294901760, %v3791_v55  ;;  %v3805_v20 = vld [vmem:[%s7538_s1 + $0x2a0] sm:$0xff]  ;;  %v8056_v10 = vand.u32 4294901760, %v6232_v49 }
  0xe4   :  { %4264 = vmatprep.subr.mxu1 %v5866_v51  ;;  %4275 = vmatprep.subr.mxu0 %v6114_v2  ;;  %v6370_v51 = vsub.f32 %v6266_v52, %v7686_v57  ;;  %8047 = vst [vmem:[#allocation29_spill] sm:$0xff] %v6388_v6  ;;  %v8049_v2 = vand.u32 4294901760, %v6290_v18 }
  0xe5   :  { %4265 = vmatpush3.msra.mxu1 %v5879_v40  ;;  %4276 = vmatpush3.msra.mxu0 %v6131_v0  ;;  %8046 = vst [vmem:[#allocation5_spill] sm:$0xff] %v6372_v14  ;;  %v1917_v40 = vcombine.high %v6316_v39, %v6316_v39  ;;  %v6394_v0 = vsub.f32 %v3792_v21, %v6342_v44  ;;  %v6415_v21 = vand.u32 4294901760, %v3806_v17 }
  0xe6   :  { %4266 = vmatprep.subr.mxu1 %v5886_v58  ;;  %4277 = vmatprep.subr.mxu0 %v6148_v1  ;;  %v6399_v58 = vsub.f32 %v6290_v18, %v8049_v2  ;;  %v6401_v1 = vand.u32 4294901760, %v3790_v54  ;;  %v8052_v18 = vand.u32 4294901760, %v6199_v47  ;;  %v6424_v45 = vsub.f32 %v3791_v55, %v6372_v14  ;;  %v3788_v2 = vld [vmem:[%s7538_s1 + $0x218] sm:$0xff] }
  0xe7   :  { %4267 = vmatpush3.msra.mxu1 %v5896_v37  ;;  %1857 = vmatprep.mubr.f32.mxu1 %v8035_v22  ;;  %8048 = vst [vmem:[#allocation31_spill] sm:$0xff] %v6394_v0  ;;  %v3789_v37 = vld [vmem:[%s7538_s1 + $0x220] sm:$0xff]  ;;  %v6410_v22 = vsub.f32 %v3808_v8, %v6340_v59  ;;  %8051 = vst [vmem:[#allocation27_spill] sm:$0xff] %v6415_v21  ;;  %v1931_v57 = vrot.slane %v1917_v40, %v8042_v16  ;;  %v8054_v47 = vand.u32 4294901760, %v6322_v24  ;;  %v3787_v40 = vld [vmem:[%s7538_s1 + $0x210] sm:$0xff] }
  0xe8   :  { %8050 = vst [vmem:[#allocation30_spill] sm:$0xff] %v6401_v1  ;;  %4278 = vmatpush3.msra.mxu0 %v6163_v23  ;;  %1859 = vmatmul.mubr.f32.vlgmr.msra.gmra.mxu1 %v8038_v56  ;;  %v6439_v55 = vand.u32 4294901760, %v3805_v20  ;;  %v6441_v8 = vand.u32 4294901760, %v3789_v37  ;;  %v3804_v56 = vld [vmem:[%s7538_s1 + $0x298] sm:$0xff]  ;;  %v6460_v23 = vsub.f32 %v3807_v53, %v6388_v6  ;;  %v8062_v53 = vand.u32 4294901760, %v6287_v28 }
  0xe9   :  { %4279 = vmatprep.subr.mxu0 %v6165_v42  ;;  %4306 = vmatprep.subr.mxu1 %v8052_v18  ;;  %v6437_v18 = vsub.f32 %v6322_v24, %v8054_v47  ;;  %v8057_v24 = vand.u32 4294901760, %v6249_v36  ;;  %v6475_v47 = vand.u32 4294901760, %v3788_v2  ;;  %v3803_v42 = vld [vmem:[%s7538_s1 + $0x290] sm:$0xff]  ;;  %v6484_v36 = vand.u32 4294901760, %v3804_v56 }
  0xea   :  { %4280 = vmatpush3.msra.mxu0 %v6184_v38  ;;  %4307 = vmatpush3.msra.mxu1 %v8053_v34  ;;  %8055 = vst [vmem:[#allocation23_spill] sm:$0xff] %v6441_v8  ;;  %v1924_v34 = vrot.slane %v6316_v39, %v8042_v16  ;;  %v6456_v38 = vsub.f32 %v3790_v54, %v6401_v1  ;;  %v8058_v39 = vand.u32 4294901760, %v6363_v33  ;;  %v6491_v16 = vand.u32 4294901760, %v1931_v57 }
  0xeb   :  { %4281 = vmatprep.subr.mxu0 %v6201_v63  ;;  %4308 = vmatprep.subr.mxu1 %v8056_v10  ;;  %v8059_v10 = vand.u32 4294901760, %v6352_v61  ;;  %v8066_v63 = vand.u32 4294901760, %v6410_v22  ;;  %v6511_v28 = vand.u32 4294901760, %v3803_v42 }
  0xec   :  { %4282 = vmatpush3.msra.mxu0 %v6203_v7  ;;  %4309 = vmatpush3.msra.mxu1 %v8057_v24  ;;  %v6468_v49 = vsub.f32 %v6363_v33, %v8058_v39  ;;  %v8060_v24 = vand.u32 4294901760, %v6274_v19  ;;  %v6486_v39 = vand.u32 4294901760, %v3787_v40  ;;  %8061 = vst [vmem:[#allocation20_spill] sm:$0xff] %v6491_v16  ;;  %v2093_v7 = vand.u32 4294901760, %v6437_v18 }
  0xed   :  { %v6473_v54 = vsub.f32 %v6352_v61, %v8059_v10  ;;  %4283 = vmatprep.subr.mxu0 %v6234_v60  ;;  %v6489_v10 = vsub.f32 %v3806_v17, %v6415_v21  ;;  %v6498_v60 = vsub.f32 %v3789_v37, %v6441_v8  ;;  %v8065_v17 = vand.u32 4294901760, %v6299_v3  ;;  %8067 = vst [vmem:[#allocation22_spill] sm:$0xff] %v6511_v28  ;;  %v3802_v37 = vld [vmem:[%s7538_s1 + $0x288] sm:$0xff] }
  0xee   :  { %4310 = vmatprep.subr.mxu1 %v8060_v24  ;;  %4284 = vmatpush3.msra.mxu0 %v6276_v43  ;;  %v6501_v24 = vand.u32 4294901760, %v1924_v34  ;;  %v6509_v43 = vsub.f32 %v6410_v22, %v8066_v63  ;;  %v8068_v3 = vand.u32 4294901760, %v6327_v32  ;;  %v6526_v19 = vsub.f32 %v3788_v2, %v6475_v47  ;;  %v3801_v2 = vld [vmem:[%s7538_s1 + $0x280] sm:$0xff] }
  0xef   :  { %4311 = vmatpush3.msra.mxu1 %v8062_v53  ;;  %8063 = vst [vmem:[#allocation33_spill] sm:$0xff] %v6498_v60  ;;  %4285 = vmatprep.subr.mxu0 %v6294_v9  ;;  %v6518_v53 = vsub.f32 %v3805_v20, %v6439_v55  ;;  %v2100_v63 = vand.u32 4294901760, %v6473_v54  ;;  %v8069_v18 = vand.u32 4294901760, %v6394_v0  ;;  %v3786_v20 = vld [vmem:[%s7538_s1 + $0x208] sm:$0xff]  ;;  %v8070_v32 = vand.u32 4294901760, %v6332_v27 }
  0xf0   :  { %8064 = vst [vmem:[#allocation26_spill] sm:$0xff] %v6501_v24  ;;  %4312 = vmatprep.subr.mxu1 %v8065_v17  ;;  %4286 = vmatpush3.msra.mxu0 %v6301_v48  ;;  %v2212_v17 = vand.u32 4294901760, %v6468_v49  ;;  %v6538_v49 = vsub.f32 %v3787_v40, %v6486_v39  ;;  %v8071_v27 = vand.u32 4294901760, %v6357_v4  ;;  %v8072_v40 = vand.u32 4294901760, %v6424_v45 }
  0xf1   :  { %4313 = vmatpush3.msra.mxu1 %v8068_v3  ;;  %v2106_v9 = vsub.f32 %v6394_v0, %v8069_v18  ;;  %4287 = vmatprep.subr.mxu0 %v6340_v59  ;;  %v3785_v18 = vld [vmem:[%s7538_s1 + $0x200] sm:$0xff]  ;;  %v6548_v3 = vsub.f32 %v1931_v57, %v6491_v16  ;;  %v6551_v59 = vsub.f32 %v3804_v56, %v6484_v36  ;;  %v6559_v54 = vand.u32 4294901760, %v3802_v37 }
  0xf2   :  { %4314 = vmatprep.subr.mxu1 %v8070_v32  ;;  %4288 = vmatpush3.msra.mxu0 %v6342_v44  ;;  %v2113_v32 = vsub.f32 %v6424_v45, %v8072_v40  ;;  %v6563_v0 = vsub.f32 %v1924_v34, %v6501_v24  ;;  %v8073_v57 = vand.u32 4294901760, %v6370_v51  ;;  %v2219_v56 = vand.u32 4294901760, %v6509_v43 }
  0xf3   :  { %4315 = vmatpush3.msra.mxu1 %v8071_v27  ;;  %4289 = vmatprep.subr.mxu0 %v6388_v6  ;;  %v8074_v4 = vand.u32 4294901760, %v6460_v23  ;;  %v6572_v44 = vand.u32 4294901760, %v3786_v20  ;;  %v8075_v34 = vand.u32 4294901760, %v6377_v5  ;;  %v6578_v48 = vand.u32 4294901760, %v3801_v2 }
  0xf4   :  { %4316 = vmatprep.subr.mxu1 %v8073_v57  ;;  %4290 = vmatpush3.msra.mxu0 %v6372_v14  ;;  %v6580_v6 = vand.u32 4294901760, %v3785_v18  ;;  %v6584_v43 = vsub.f32 %v3803_v42, %v6511_v28  ;;  %v8076_v57 = vand.u32 4294901760, %v6399_v58  ;;  %v8077_v40 = vand.u32 4294901760, %v6489_v10 }
  0xf5   :  { %v2225_v27 = vsub.f32 %v6460_v23, %v8074_v4  ;;  %4317 = vmatpush3.msra.mxu1 %v8075_v34  ;;  %4291 = vmatprep.subr.mxu0 %v6415_v21  ;;  %v2107_v4 = vand.u32 4294901760, %v2106_v9  ;;  %v7731_v34 = vand.u32 4294901760, %v6548_v3  ;;  %v2114_v51 = vand.u32 4294901760, %v2113_v32 }
  0xf6   :  { %4318 = vmatprep.subr.mxu1 %v8076_v57  ;;  %v2232_v5 = vsub.f32 %v6489_v10, %v8077_v40  ;;  %4292 = vmatpush3.msra.mxu0 %v6401_v1  ;;  %v8078_v42 = vand.u32 4294901760, %v6456_v38  ;;  %v6600_v9 = vsub.f32 %v3802_v37, %v6559_v54  ;;  %v6604_v57 = vsub.f32 %v3786_v20, %v6572_v44 }
  0xf7   :  { %4319 = vmatpush3.msra.mxu1 %v2093_v7  ;;  %4293 = vmatprep.subr.mxu0 %v6439_v55  ;;  %v2226_v40 = vand.u32 4294901760, %v2225_v27  ;;  %v8079_v14 = vand.u32 4294901760, %v6518_v53  ;;  %v8081_v37 = vand.u32 4294901760, %v6498_v60  ;;  %v6619_v20 = vsub.f32 %v3801_v2, %v6578_v48 }
  0xf8   :  { %v2120_v21 = vsub.f32 %v6456_v38, %v8078_v42  ;;  %4320 = vmatprep.subr.mxu1 %v2212_v17  ;;  %4294 = vmatpush3.msra.mxu0 %v6441_v8  ;;  %v6612_v42 = vsub.f32 %v3785_v18, %v6580_v6  ;;  %v8083_v18 = vand.u32 4294901760, %v6551_v59  ;;  %v8084_v2 = vand.u32 4294901760, %v6563_v0 }
  0xf9   :  { %v2239_v7 = vsub.f32 %v6518_v53, %v8079_v14  ;;  %4321 = vmatpush3.msra.mxu1 %v2100_v63  ;;  %v2127_v17 = vsub.f32 %v6498_v60, %v8081_v37  ;;  %8082 = vst [vmem:[#allocation34_spill] sm:$0xff] %v6619_v20  ;;  %4295 = vmatprep.subr.mxu0 %v6484_v36  ;;  %v2233_v14 = vand.u32 4294901760, %v2232_v5 }
  0xfa   :  { %8080 = vst [vmem:[#allocation32_spill] sm:$0xff] %v6612_v42  ;;  %4322 = vmatprep.subr.mxu1 %v2219_v56  ;;  %v2033_v63 = vsub.f32 %v6548_v3, %v7731_v34  ;;  %v2246_v32 = vsub.f32 %v6551_v59, %v8083_v18  ;;  %4296 = vmatpush3.msra.mxu0 %v6475_v47  ;;  %v2121_v37 = vand.u32 4294901760, %v2120_v21  ;;  %v8085_v34 = vand.u32 4294901760, %v6526_v19 }
  0xfb   :  { %4323 = vmatpush3.msra.mxu1 %v2107_v4  ;;  %v2039_v27 = vsub.f32 %v6563_v0, %v8084_v2  ;;  %4297 = vmatprep.subr.mxu0 %v6511_v28  ;;  %v2240_v5 = vand.u32 4294901760, %v2239_v7  ;;  %v2128_v21 = vand.u32 4294901760, %v2127_v17  ;;  %v8086_v4 = vand.u32 4294901760, %v6584_v43 }
  0xfc   :  { %4324 = vmatprep.subr.mxu1 %v2226_v40  ;;  %v2134_v18 = vsub.f32 %v6526_v19, %v8085_v34  ;;  %4298 = vmatpush3.msra.mxu0 %v6486_v39  ;;  %v7735_v56 = vand.u32 4294901760, %v6619_v20  ;;  %v2034_v40 = vand.u32 4294901760, %v2033_v63  ;;  %v2247_v7 = vand.u32 4294901760, %v2246_v32 }
  0xfd   :  { %4325 = vmatpush3.msra.mxu1 %v2114_v51  ;;  %v2253_v2 = vsub.f32 %v6584_v43, %v8086_v4  ;;  %4299 = vmatprep.subr.mxu0 %v6559_v54  ;;  %v8087_v28 = vand.u32 4294901760, %v6538_v49  ;;  %v7734_v58 = vand.u32 4294901760, %v6612_v42  ;;  %v2040_v51 = vand.u32 4294901760, %v2039_v27 }
  0xfe   :  { %4326 = vmatprep.subr.mxu1 %v2233_v14  ;;  %4300 = vmatpush3.msra.mxu0 %v6572_v44  ;;  %v8088_v17 = vand.u32 4294901760, %v6600_v9  ;;  %v2135_v14 = vand.u32 4294901760, %v2134_v18  ;;  %v8089_v32 = vand.u32 4294901760, %v6604_v57  ;;  %v2267_v27 = vsub.f32 %v6619_v20, %v7735_v56  ;;  %v8107_v56 = vld [vmem:[#allocation9_spill] sm:$0xff] }
  0xff   :  { %v2141_v34 = vsub.f32 %v6538_v49, %v8087_v28  ;;  %4327 = vmatpush3.msra.mxu1 %v2121_v37  ;;  %4301 = vmatprep.subr.mxu0 %v6578_v48  ;;  %v2254_v28 = vand.u32 4294901760, %v2253_v2 }
 0x100   :  { %v2260_v4 = vsub.f32 %v6600_v9, %v8088_v17  ;;  %4328 = vmatprep.subr.mxu1 %v2240_v5  ;;  %v2148_v63 = vsub.f32 %v6604_v57, %v8089_v32  ;;  %4302 = vmatpush3.msra.mxu0 %v6580_v6  ;;  %v2155_v5 = vsub.f32 %v6612_v42, %v7734_v58  ;;  %v2268_v2 = vand.u32 4294901760, %v2267_v27  ;;  %v8093_v17 = vld [vmem:[#allocation24_spill] sm:$0xff]  ;;  %v8096_v32 = vld [vmem:[#allocation6_spill] sm:$0xff]  ;;  %v8099_v27 = vld [vmem:[#allocation7_spill] sm:$0xff] }
 0x101   :  { %4329 = vmatpush3.msra.mxu1 %v2128_v21  ;;  %2035 = vmatprep.mubr.f32.mxu0 %v2034_v40  ;;  %v2142_v37 = vand.u32 4294901760, %v2141_v34  ;;  %v8091_v34 = vld [vmem:[#allocation19_spill] sm:$0xff]  ;;  %v8106_v58 = vld [vmem:[#allocation16_spill] sm:$0xff] }
 0x102   :  { %4330 = vmatprep.subr.mxu1 %v2247_v7  ;;  %4341 = vmatprep.subr.mxu0 %v6120_v35  ;;  %v2261_v18 = vand.u32 4294901760, %v2260_v4  ;;  %v2149_v21 = vand.u32 4294901760, %v2148_v63  ;;  %v2156_v40 = vand.u32 4294901760, %v2155_v5  ;;  %v8090_v7 = vld [vmem:[#allocation11_spill] sm:$0xff]  ;;  %v8097_v63 = vld [vmem:[#allocation17_spill] sm:$0xff]  ;;  %v8101_v5 = vld [vmem:[#allocation8_spill] sm:$0xff] }
 0x103   :  { %2041 = vmatmul.mubr.f32.vlgmr.msra.gmra.mxu0 %v2040_v51  ;;  %4331 = vmatpush3.msra.mxu1 %v2135_v14  ;;  %v8092_v51 = vld [vmem:[#allocation13_spill] sm:$0xff]  ;;  %v8094_v4 = vld [vmem:[#allocation15_spill] sm:$0xff]  ;;  %v8095_v14 = vld [vmem:[#allocation14_spill] sm:$0xff] }
 0x104   :  { %4342 = vmatpush3.msra.mxu0 %v6129_v30  ;;  %4332 = vmatprep.subr.mxu1 %v2254_v28  ;;  %v8098_v28 = vld [vmem:[#allocation31_spill] sm:$0xff] }
 0x105   :  { %4343 = vmatprep.subr.mxu0 %v6140_v41  ;;  %4333 = vmatpush3.msra.mxu1 %v2142_v37  ;;  %v8100_v37 = vld [vmem:[#allocation18_spill] sm:$0xff] }
 0x106   :  { %4344 = vmatpush3.msra.mxu0 %v6146_v12  ;;  %4334 = vmatprep.subr.mxu1 %v2261_v18  ;;  %v8102_v18 = vld [vmem:[#allocation25_spill] sm:$0xff] }
 0x107   :  { %4345 = vmatprep.subr.mxu0 %v6158_v26  ;;  %4335 = vmatpush3.msra.mxu1 %v2149_v21  ;;  %v8103_v21 = vld [vmem:[#allocation10_spill] sm:$0xff] }
 0x108   :  { %4346 = vmatpush3.msra.mxu0 %v6177_v13  ;;  %4336 = vmatprep.subr.mxu1 %v2268_v2  ;;  %v8104_v2 = vld [vmem:[#allocation12_spill] sm:$0xff] }
 0x109   :  { %4347 = vmatprep.subr.mxu0 %v6191_v15  ;;  %4337 = vmatpush3.msra.mxu1 %v2156_v40  ;;  %v8105_v40 = vld [vmem:[#allocation21_spill] sm:$0xff] }
 0x10a   :  { %2271 = vmatprep.mubr.f32.mxu1 %v6491_v16  ;;  %4348 = vmatpush3.msra.mxu0 %v6210_v29  ;;  %v8109_v16 = vld [vmem:[#allocation5_spill] sm:$0xff] }
 0x10b   :  { %2273 = vmatmul.mubr.f32.vlgmr.msra.gmra.mxu1 %v6501_v24  ;;  %4349 = vmatprep.subr.mxu0 %v6213_v62  ;;  %v8108_v24 = vld [vmem:[#allocation29_spill] sm:$0xff] }
 0x10c   :  { %4376 = vmatprep.subr.mxu1 %v6085_v25  ;;  %4350 = vmatpush3.msra.mxu0 %v6244_v31 }
 0x10d   :  { %4377 = vmatpush3.msra.mxu1 %v6099_v11  ;;  %4351 = vmatprep.subr.mxu0 %v6266_v52 }
 0x10e   :  { %4378 = vmatprep.subr.mxu1 %v6101_v46  ;;  %4352 = vmatpush3.msra.mxu0 %v6257_v50 }
 0x10f   :  { %4379 = vmatpush3.msra.mxu1 %v8090_v7  ;;  %4353 = vmatprep.subr.mxu0 %v8091_v34 }
 0x110   :  { %4380 = vmatprep.subr.mxu1 %v8092_v51  ;;  %4354 = vmatpush3.msra.mxu0 %v8093_v17 }
 0x111   :  { %4381 = vmatpush3.msra.mxu1 %v8094_v4  ;;  %4355 = vmatprep.subr.mxu0 %v6363_v33 }
 0x112   :  { %4382 = vmatprep.subr.mxu1 %v8095_v14  ;;  %4356 = vmatpush3.msra.mxu0 %v6352_v61 }
 0x113   :  { %4383 = vmatpush3.msra.mxu1 %v8096_v32  ;;  %4357 = vmatprep.subr.mxu0 %v6410_v22 }
 0x114   :  { %4384 = vmatprep.subr.mxu1 %v8097_v63  ;;  %4358 = vmatpush3.msra.mxu0 %v8098_v28 }
 0x115   :  { %4385 = vmatpush3.msra.mxu1 %v8099_v27  ;;  %4359 = vmatprep.subr.mxu0 %v6460_v23 }
 0x116   :  { %4386 = vmatprep.subr.mxu1 %v8100_v37  ;;  %4360 = vmatpush3.msra.mxu0 %v6424_v45 }
 0x117   :  { %4387 = vmatpush3.msra.mxu1 %v8101_v5  ;;  %4361 = vmatprep.subr.mxu0 %v6489_v10 }
 0x118   :  { %4388 = vmatprep.subr.mxu1 %v8102_v18  ;;  %4362 = vmatpush3.msra.mxu0 %v6456_v38 }
 0x119   :  { %4389 = vmatpush3.msra.mxu1 %v8103_v21  ;;  %4363 = vmatprep.subr.mxu0 %v6518_v53 }
 0x11a   :  { %4390 = vmatprep.subr.mxu1 %v8104_v2  ;;  %4364 = vmatpush3.msra.mxu0 %v6498_v60  ;;  %v8110_v60 = vld [vmem:[#allocation27_spill] sm:$0xff] }
 0x11b   :  { %4391 = vmatpush3.msra.mxu1 %v8105_v40  ;;  %4365 = vmatprep.subr.mxu0 %v6551_v59 }
 0x11c   :  { %4392 = vmatprep.subr.mxu1 %v8106_v58  ;;  %4366 = vmatpush3.msra.mxu0 %v6526_v19 }
 0x11d   :  { %4393 = vmatpush3.msra.mxu1 %v8107_v56  ;;  %4367 = vmatprep.subr.mxu0 %v6584_v43 }
 0x11e   :  { %4394 = vmatprep.subr.mxu1 %v8108_v24  ;;  %4368 = vmatpush3.msra.mxu0 %v6538_v49 }
 0x11f   :  { %4395 = vmatpush3.msra.mxu1 %v8109_v16  ;;  %4369 = vmatprep.subr.mxu0 %v6600_v9 }
 0x120   :  { %4396 = vmatprep.subr.mxu1 %v8110_v60  ;;  %4370 = vmatpush3.msra.mxu0 %v6604_v57  ;;  %v8111_v60 = vand.u32 4294901760, %v6120_v35  ;;  %v8116_v35 = vand.u32 4294901760, %v6158_v26  ;;  %v8120_v26 = vand.u32 4294901760, %v6210_v29  ;;  %v3883_v29 = vpop.f32.mrf.mxu0 }
 0x121   :  { %4397 = vmatpush3.msra.mxu1 %v6401_v1  ;;  %4371 = vmatprep.subr.mxu0 %v6619_v20  ;;  %v8112_v1 = vand.u32 4294901760, %v6129_v30  ;;  %v8113_v20 = vld [vmem:[#allocation22_spill] sm:$0xff]  ;;  %v8117_v30 = vand.u32 4294901760, %v6177_v13  ;;  %v8121_v13 = vand.u32 4294901760, %v6563_v0 }
 0x122   :  { %4398 = vmatprep.subr.mxu1 %v6439_v55  ;;  %4372 = vmatpush3.msra.mxu0 %v6612_v42  ;;  %v8114_v42 = vand.u32 4294901760, %v6140_v41  ;;  %v8118_v41 = vand.u32 4294901760, %v6191_v15  ;;  %v3834_v15 = vld [vmem:[%s7538_s1 + $0x378] sm:$0xff] }
 0x123   :  { %2408 = vmatprep.mubr.f32.mxu0 %v6548_v3  ;;  %4399 = vmatpush3.msra.mxu1 %v6441_v8  ;;  %v8115_v8 = vand.u32 4294901760, %v6146_v12  ;;  %v3850_v12 = vld [vmem:[%s7538_s1 + $0x3f8] sm:$0xff] }
 0x124   :  { %2411 = vmatmul.mubr.f32.vlgmr.msra.gmra.mxu0 %v6563_v0  ;;  %4400 = vmatprep.subr.mxu1 %v6484_v36  ;;  %v3849_v0 = vld [vmem:[%s7538_s1 + $0x3f0] sm:$0xff] }
 0x125   :  { %4411 = vmatprep.subr.mxu0 %v8111_v60  ;;  %4401 = vmatpush3.msra.mxu1 %v6475_v47  ;;  %v8122_v60 = vand.u32 4294901760, %v6213_v62  ;;  %v6772_v62 = vand.u32 4294901760, %v3834_v15 }
 0x126   :  { %4412 = vmatpush3.msra.mxu0 %v8112_v1  ;;  %4402 = vmatprep.subr.mxu1 %v8113_v20  ;;  %v8119_v1 = vand.u32 4294901760, %v6548_v3  ;;  %v8123_v3 = vand.u32 4294901760, %v6244_v31  ;;  %v3918_v31 = vpop.f32.mrf.mxu1 }
 0x127   :  { %4413 = vmatprep.subr.mxu0 %v8114_v42  ;;  %4403 = vmatpush3.msra.mxu1 %v6486_v39  ;;  %v8124_v42 = vand.u32 4294901760, %v6266_v52 }
 0x128   :  { %4414 = vmatpush3.msra.mxu0 %v8115_v8  ;;  %4404 = vmatprep.subr.mxu1 %v6559_v54  ;;  %v6761_v8 = vand.u32 4294901760, %v3850_v12 }
 0x129   :  { %4415 = vmatprep.subr.mxu0 %v8116_v35  ;;  %4405 = vmatpush3.msra.mxu1 %v6572_v44  ;;  %v6780_v35 = vand.u32 4294901760, %v3849_v0 }
 0x12a   :  { %4416 = vmatpush3.msra.mxu0 %v8117_v30  ;;  %4406 = vmatprep.subr.mxu1 %v6578_v48  ;;  %v6783_v52 = vsub.f32 %v3850_v12, %v6761_v8  ;;  %v8129_v30 = vand.u32 4294901760, %v6352_v61  ;;  %v8130_v12 = vand.u32 4294901760, %v6410_v22 }
 0x12b   :  { %4417 = vmatprep.subr.mxu0 %v8118_v41  ;;  %4407 = vmatpush3.msra.mxu1 %v6580_v6  ;;  %v6813_v61 = vsub.f32 %v3849_v0, %v6780_v35  ;;  %v8137_v0 = vand.u32 4294901760, %v6489_v10 }
 0x12c   :  { %2515 = vmatprep.mubr.f32.mxu1 %v8119_v1  ;;  %4418 = vmatpush3.msra.mxu0 %v8120_v26  ;;  %v7749_v1 = vand.u32 4294901760, %v6783_v52 }
 0x12d   :  { %2519 = vmatmul.mubr.f32.vlgmr.msra.gmra.mxu1 %v8121_v13  ;;  %4419 = vmatprep.subr.mxu0 %v8122_v60  ;;  %v8134_v13 = vand.u32 4294901760, %v6460_v23  ;;  %v8135_v60 = vand.u32 4294901760, %v6424_v45  ;;  %v3846_v45 = vld [vmem:[%s7538_s1 + $0x3d8] sm:$0xff] }
 0x12e   :  { %4446 = vmatprep.subr.mxu1 %v6085_v25  ;;  %4420 = vmatpush3.msra.mxu0 %v8123_v3  ;;  %v8125_v25 = vand.u32 4294901760, %v6257_v50  ;;  %v3833_v50 = vld [vmem:[%s7538_s1 + $0x370] sm:$0xff] }
 0x12f   :  { %4447 = vmatpush3.msra.mxu1 %v6099_v11  ;;  %4421 = vmatprep.subr.mxu0 %v8124_v42  ;;  %v8126_v11 = vand.u32 4294901760, %v8091_v34  ;;  %v8128_v34 = vand.u32 4294901760, %v6363_v33  ;;  %v6806_v33 = vand.u32 4294901760, %v3833_v50  ;;  %v7747_v42 = vand.u32 4294901760, %v6813_v61 }
 0x130   :  { %4448 = vmatprep.subr.mxu1 %v6101_v46  ;;  %4422 = vmatpush3.msra.mxu0 %v8125_v25  ;;  %v8127_v46 = vand.u32 4294901760, %v8093_v17  ;;  %v3848_v17 = vld [vmem:[%s7538_s1 + $0x3e8] sm:$0xff]  ;;  %v8139_v25 = vand.u32 4294901760, %v6456_v38 }
 0x131   :  { %4449 = vmatpush3.msra.mxu1 %v8090_v7  ;;  %4423 = vmatprep.subr.mxu0 %v8126_v11  ;;  %v3884_v7 = vpop.f32.mrf.mxu0  ;;  %8131 = vst [vmem:[#allocation11_spill] sm:$0xff] %v6806_v33  ;;  %v6818_v22 = vand.u32 4294901760, %v3848_v17  ;;  %v6839_v23 = vsub.f32 %v3833_v50, %v6806_v33 }
 0x132   :  { %4450 = vmatprep.subr.mxu1 %v8092_v51  ;;  %4424 = vmatpush3.msra.mxu0 %v8127_v46  ;;  %v6795_v51 = vsub.f32 %v3834_v15, %v6772_v62  ;;  %v8140_v46 = vand.u32 4294901760, %v6518_v53 }
 0x133   :  { %4451 = vmatpush3.msra.mxu1 %v8094_v4  ;;  %4425 = vmatprep.subr.mxu0 %v8128_v34  ;;  %v3919_v4 = vpop.f32.mrf.mxu1  ;;  %v3953_v41 = vpop.f32.mrf.mxu0  ;;  %8133 = vst [vmem:[#allocation19_spill] sm:$0xff] %v6818_v22 }
 0x134   :  { %4452 = vmatprep.subr.mxu1 %v8095_v14  ;;  %4426 = vmatpush3.msra.mxu0 %v8129_v30  ;;  %v3832_v14 = vld [vmem:[%s7538_s1 + $0x368] sm:$0xff]  ;;  %v7748_v15 = vand.u32 4294901760, %v6795_v51  ;;  %v3920_v10 = vadd.f32 %v3919_v4, %v3918_v31  ;;  %v3830_v31 = vld [vmem:[%s7538_s1 + $0x358] sm:$0xff]  ;;  %v6877_v4 = vand.u32 4294901760, %v3846_v45 }
 0x135   :  { %4453 = vmatpush3.msra.mxu1 %v8096_v32  ;;  %4427 = vmatprep.subr.mxu0 %v8130_v12  ;;  %v8132_v32 = vand.u32 4294901760, %v8098_v28  ;;  %v3988_v26 = vpop.f32.mrf.mxu1  ;;  %v6830_v28 = vand.u32 4294901760, %v3832_v14  ;;  %v3954_v3 = vpop.f32.mrf.mxu0  ;;  %v3845_v12 = vld [vmem:[%s7538_s1 + $0x3d0] sm:$0xff] }
 0x136   :  { %4454 = vmatprep.subr.mxu1 %v8097_v63  ;;  %v3847_v63 = vld [vmem:[%s7538_s1 + $0x3e0] sm:$0xff]  ;;  %v6869_v38 = vsub.f32 %v6795_v51, %v7748_v15  ;;  %v3955_v34 = vadd.f32 %v3954_v3, %v3953_v41  ;;  %8144 = vst [vmem:[#allocation14_spill] sm:$0xff] %v6877_v4  ;;  %v6892_v41 = vsub.f32 %v6813_v61, %v7747_v42  ;;  %v8146_v3 = vand.u32 4294901760, %v6526_v19  ;;  %v3824_v19 = vld [vmem:[%s7538_s1 + $0x328] sm:$0xff] }
 0x137   :  { %4428 = vmatpush3.msra.mxu0 %v8132_v32  ;;  %4455 = vmatpush3.msra.mxu1 %v8099_v27  ;;  %8136 = vst [vmem:[#allocation13_spill] sm:$0xff] %v6830_v28  ;;  %v3831_v27 = vld [vmem:[%s7538_s1 + $0x360] sm:$0xff]  ;;  %v3989_v11 = vpop.f32.mrf.mxu1 }
 0x138   :  { %4429 = vmatprep.subr.mxu0 %v8134_v13  ;;  %4456 = vmatprep.subr.mxu1 %v8100_v37  ;;  %v6841_v37 = vand.u32 4294901760, %v3847_v63  ;;  %v6861_v50 = vand.u32 4294901760, %v3831_v27 }
 0x139   :  { %4430 = vmatpush3.msra.mxu0 %v8135_v60  ;;  %4457 = vmatpush3.msra.mxu1 %v8101_v5  ;;  %v6849_v5 = vsub.f32 %v6783_v52, %v7749_v1  ;;  %v3990_v60 = vadd.f32 %v3989_v11, %v3988_v26  ;;  %v8151_v11 = vand.u32 4294901760, %v6538_v49  ;;  %v8163_v1 = vld [vmem:[#allocation23_spill] sm:$0xff] }
 0x13a   :  { %4431 = vmatprep.subr.mxu0 %v8137_v0  ;;  %4458 = vmatprep.subr.mxu1 %v8102_v18  ;;  %8138 = vst [vmem:[#allocation24_spill] sm:$0xff] %v6841_v37  ;;  %v6856_v18 = vsub.f32 %v3848_v17, %v6818_v22  ;;  %8141 = vst [vmem:[#allocation15_spill] sm:$0xff] %v6861_v50  ;;  %v8142_v17 = vld [vmem:[#allocation33_spill] sm:$0xff]  ;;  %v6896_v32 = vsub.f32 %v3847_v63, %v6841_v37 }
 0x13b   :  { %4432 = vmatpush3.msra.mxu0 %v8139_v25  ;;  %4459 = vmatpush3.msra.mxu1 %v8103_v21  ;;  %v3885_v21 = vadd.f32 %v3884_v7, %v3883_v29  ;;  %v8143_v30 = vand.u32 4294901760, %v8142_v17  ;;  %v4023_v53 = vpop.f32.mrf.mxu0  ;;  %v3829_v29 = vld [vmem:[%s7538_s1 + $0x350] sm:$0xff]  ;;  %v8145_v7 = vand.u32 4294901760, %v6551_v59  ;;  %v3844_v0 = vld [vmem:[%s7538_s1 + $0x3c8] sm:$0xff]  ;;  %v6911_v63 = vsub.f32 %v3831_v27, %v6861_v50 }
 0x13c   :  { %4433 = vmatprep.subr.mxu0 %v8140_v46  ;;  %4460 = vmatprep.subr.mxu1 %v8104_v2  ;;  %v6875_v2 = vsub.f32 %v3832_v14, %v6830_v28  ;;  %v7746_v14 = vand.u32 4294901760, %v6839_v23  ;;  %v7745_v25 = vand.u32 4294901760, %v6856_v18  ;;  %v8148_v46 = vand.u32 4294901760, %v6584_v43  ;;  %v3818_v27 = vld [vmem:[%s7537_s0 + $0xb] ss:$4 sm:$0x3] }
 0x13d   :  { %4434 = vmatpush3.msra.mxu0 %v8143_v30  ;;  %4461 = vmatpush3.msra.mxu1 %v8105_v40  ;;  %v415_v13 = vadd.f32 %v3920_v10, %v3885_v21  ;;  %v4024_v59 = vpop.f32.mrf.mxu0  ;;  %v6916_v26 = vand.u32 4294901760, %v3829_v29  ;;  %v6922_v43 = vsub.f32 %v3846_v45, %v6877_v4  ;;  %v8152_v17 = vand.u32 4294901760, %v6600_v9  ;;  %v3828_v30 = vld [vmem:[%s7538_s1 + $0x348] sm:$0xff] }
 0x13e   :  { %4435 = vmatprep.subr.mxu0 %v8145_v7  ;;  %4462 = vmatprep.subr.mxu1 %v8106_v58  ;;  %v6901_v58 = vand.u32 4294901760, %v3830_v31  ;;  %v4025_v21 = vadd.f32 %v4024_v59, %v4023_v53  ;;  %v6938_v45 = vand.u32 4294901760, %v3844_v0  ;;  %v7751_v53 = vand.u32 4294901760, %v6875_v2 }
 0x13f   :  { %4436 = vmatpush3.msra.mxu0 %v8146_v3  ;;  %4463 = vmatpush3.msra.mxu1 %v8107_v56  ;;  %v6914_v56 = vand.u32 4294901760, %v3845_v12  ;;  %8150 = vst [vmem:[#allocation31_spill] sm:$0xff] %v6916_v26  ;;  %v553_v10 = vadd.f32 %v3955_v34, %v415_v13  ;;  %v8153_v34 = vld [vmem:[#allocation27_spill] sm:$0xff]  ;;  %v4058_v49 = vpop.f32.mrf.mxu1  ;;  %v7750_v7 = vand.u32 4294901760, %v6896_v32  ;;  %v8155_v13 = vand.u32 4294901760, %v6604_v57  ;;  %v8156_v3 = vld [vmem:[#allocation30_spill] sm:$0xff] }
 0x140   :  { %8147 = vst [vmem:[#allocation6_spill] sm:$0xff] %v6901_v58  ;;  %4437 = vmatprep.subr.mxu0 %v8148_v46  ;;  %4464 = vmatprep.subr.mxu1 %v8108_v24  ;;  %v3817_v24 = vld [vmem:[%s7537_s0 + $0x3] ss:$4 sm:$0x3]  ;;  %8154 = vst [vmem:[#allocation7_spill] sm:$0xff] %v6938_v45  ;;  %v6949_v59 = vsub.f32 %v3830_v31, %v6901_v58  ;;  %v6961_v57 = vsub.f32 %v3829_v29, %v6916_v26  ;;  %v6976_v42 = vand.u32 4294901760, %v3828_v30 }
 0x141   :  { %8149 = vst [vmem:[#allocation17_spill] sm:$0xff] %v6914_v56  ;;  %4438 = vmatpush3.msra.mxu0 %v8151_v11  ;;  %4465 = vmatpush3.msra.mxu1 %v8109_v16  ;;  %v6936_v16 = vsub.f32 %v6839_v23, %v7746_v14  ;;  %v661_v9 = vadd.f32 %v3990_v60, %v553_v10  ;;  %v4059_v60 = vpop.f32.mrf.mxu1  ;;  %v3843_v31 = vld [vmem:[%s7538_s1 + $0x3c0] sm:$0xff]  ;;  %v7753_v15 = vand.u32 4294901760, %v6922_v43  ;;  %v8164_v46 = vld [vmem:[#allocation26_spill] sm:$0xff] }
 0x142   :  { %4439 = vmatprep.subr.mxu0 %v8152_v17  ;;  %4466 = vmatprep.subr.mxu1 %v8153_v34  ;;  %v6955_v11 = vsub.f32 %v6856_v18, %v7745_v25  ;;  %v8157_v17 = vld [vmem:[#allocation34_spill] sm:$0xff]  ;;  %v3827_v10 = vld [vmem:[%s7538_s1 + $0x340] sm:$0xff]  ;;  %v4060_v14 = vadd.f32 %v4059_v60, %v4058_v49  ;;  %8162 = vst [vmem:[#allocation18_spill] sm:$0xff] %v6976_v42  ;;  %v3826_v60 = vld [vmem:[%s7538_s1 + $0x338] sm:$0xff] }
 0x143   :  { %4440 = vmatpush3.msra.mxu0 %v8155_v13  ;;  %4467 = vmatpush3.msra.mxu1 %v8156_v3  ;;  %v8158_v34 = vand.u32 4294901760, %v8157_v17  ;;  %v7752_v13 = vand.u32 4294901760, %v6911_v63  ;;  %v6971_v3 = vsub.f32 %v3845_v12, %v6914_v56  ;;  %v2841_v17 = vcombine.low %v3817_v24, %v3818_v27  ;;  %v8161_v25 = vld [vmem:[#allocation20_spill] sm:$0xff] }
 0x144   :  { %4468 = vmatprep.subr.mxu1 %v6439_v55  ;;  %2685 = vmatprep.mubr.f32.mxu0 %v8161_v25  ;;  %v829_v29 = vadd.f32 %v4025_v21, %v661_v9  ;;  %v6984_v12 = vsub.f32 %v6875_v2, %v7751_v53  ;;  %v6989_v24 = vsub.f32 %v6896_v32, %v7750_v7  ;;  %v6996_v27 = vand.u32 4294901760, %v3843_v31  ;;  %v3842_v9 = vld [vmem:[%s7538_s1 + $0x3b8] sm:$0xff] }
 0x145   :  { %4441 = vmatprep.subr.mxu0 %v8158_v34  ;;  %v8159_v34 = vld [vmem:[#allocation32_spill] sm:$0xff]  ;;  %4469 = vmatpush3.msra.mxu1 %v8163_v1  ;;  %v6992_v21 = vsub.f32 %v3844_v0, %v6938_v45  ;;  %v6998_v49 = vand.u32 4294901760, %v3827_v10  ;;  %v7754_v0 = vand.u32 4294901760, %v6949_v59  ;;  %v7019_v53 = vsub.f32 %v3828_v30, %v6976_v42 }
 0x146   :  { %v8160_v55 = vand.u32 4294901760, %v8159_v34  ;;  %4470 = vmatprep.subr.mxu1 %v6484_v36  ;;  %v933_v1 = vadd.f32 %v4060_v14, %v829_v29  ;;  %8166 = vst [vmem:[#allocation25_spill] sm:$0xff] %v6996_v27  ;;  %v7755_v14 = vand.u32 4294901760, %v6971_v3  ;;  %v7756_v34 = vand.u32 4294901760, %v6961_v57  ;;  %2789 = vmatprep.mubr.f32.mxu1 %v8161_v25 }
 0x147   :  { %8165 = vst [vmem:[#allocation8_spill] sm:$0xff] %v6992_v21  ;;  %8167 = vst [vmem:[#allocation10_spill] sm:$0xff] %v6998_v49  ;;  %4471 = vmatpush3.msra.mxu1 %v6475_v47  ;;  %v7024_v47 = vsub.f32 %v6911_v63, %v7752_v13  ;;  %v7029_v36 = vsub.f32 %v6922_v43, %v7753_v15  ;;  %v7040_v13 = vand.u32 4294901760, %v3826_v60  ;;  %v3841_v15 = vld [vmem:[%s7538_s1 + $0x3b0] sm:$0xff] }
 0x148   :  { %4442 = vmatpush3.msra.mxu0 %v8160_v55  ;;  %v8168_v55 = vld [vmem:[#allocation28_spill] sm:$0xff]  ;;  %4472 = vmatprep.subr.mxu1 %v8113_v20  ;;  %8169 = vst [vmem:[#allocation12_spill] sm:$0xff] %v7019_v53  ;;  %v3825_v20 = vld [vmem:[%s7538_s1 + $0x330] sm:$0xff]  ;;  %937 = vst.msk [vmem:[#allocation2] sm:$0x3] %vm936_vm0, %v933_v1  ;;  %v7050_v1 = vsub.f32 %v3827_v10, %v6998_v49  ;;  %v7055_v30 = vsub.f32 %v6949_v59, %v7754_v0  ;;  %v7086_v7 = vand.u32 4294901760, %v3841_v15 }
 0x149   :  { %2687 = vmatmul.mubr.f32.vlgmr.msra.gmra.mxu0 %v8164_v46  ;;  %4481 = vmatprep.subr.mxu0 %v6761_v8  ;;  %v7013_v29 = vrot.slane %v2841_v17, %v8168_v55  ;;  %v7038_v17 = vand.u32 4294901760, %v3842_v9  ;;  %8171 = vst [vmem:[#allocation16_spill] sm:$0xff] %v7040_v13  ;;  %v7061_v40 = vsub.f32 %v3843_v31, %v6996_v27  ;;  %v7070_v10 = vand.u32 4294901760, %v3825_v20  ;;  %v3840_v31 = vld [vmem:[%s7538_s1 + $0x3a8] sm:$0xff] }
 0x14a   :  { %4482 = vmatpush3.msra.mxu0 %v6772_v62  ;;  %4473 = vmatpush3.msra.mxu1 %v6486_v39  ;;  %v7075_v0 = vsub.f32 %v6961_v57, %v7756_v34  ;;  %8173 = vst [vmem:[#allocation29_spill] sm:$0xff] %v7086_v7  ;;  %v3839_v39 = vld [vmem:[%s7538_s1 + $0x3a0] sm:$0xff]  ;;  %v8179_v34 = vand.u32 4294901760, %v6869_v38 }
 0x14b   :  { %4483 = vmatprep.subr.mxu0 %v6780_v35  ;;  %8170 = vst [vmem:[#allocation21_spill] sm:$0xff] %v7038_v17  ;;  %4474 = vmatprep.subr.mxu1 %v6559_v54  ;;  %v7068_v54 = vsub.f32 %v6971_v3, %v7755_v14  ;;  %8172 = vst [vmem:[#allocation9_spill] sm:$0xff] %v7070_v10  ;;  %v7108_v25 = vsub.f32 %v3842_v9, %v7038_v17 }
 0x14c   :  { %4484 = vmatpush3.msra.mxu0 %v6806_v33  ;;  %4475 = vmatpush3.msra.mxu1 %v6572_v44  ;;  %v2849_v44 = vcombine.high %v7013_v29, %v7013_v29  ;;  %v7122_v33 = vsub.f32 %v3825_v20, %v7070_v10  ;;  %v7137_v20 = vand.u32 4294901760, %v3839_v39  ;;  %v2856_v38 = vrot.slane %v7013_v29, %v8168_v55 }
 0x14d   :  { %4485 = vmatprep.subr.mxu0 %v6818_v22  ;;  %4476 = vmatprep.subr.mxu1 %v6578_v48  ;;  %v8175_v22 = vand.u32 4294901760, %v6992_v21  ;;  %v8185_v29 = vand.u32 4294901760, %v7050_v1 }
 0x14e   :  { %4486 = vmatpush3.msra.mxu0 %v6830_v28  ;;  %4477 = vmatpush3.msra.mxu1 %v6580_v6  ;;  %v7092_v28 = vsub.f32 %v3826_v60, %v7040_v13  ;;  %v3823_v6 = vld [vmem:[%s7538_s1 + $0x320] sm:$0xff]  ;;  %v7113_v60 = vand.u32 4294901760, %v3840_v31  ;;  %v2863_v14 = vrot.slane %v2849_v44, %v8168_v55  ;;  %v3821_v44 = vld [vmem:[%s7538_s1 + $0x310] sm:$0xff]  ;;  %v8184_v55 = vand.u32 4294901760, %v7061_v40 }
 0x14f   :  { %4487 = vmatprep.subr.mxu0 %v6841_v37  ;;  %v7097_v48 = vsub.f32 %v6992_v21, %v8175_v22  ;;  %v7099_v37 = vand.u32 4294901760, %v3824_v19  ;;  %2791 = vmatmul.mubr.f32.vlgmr.msra.gmra.mxu1 %v8164_v46  ;;  %v8178_v21 = vand.u32 4294901760, %v6849_v5  ;;  %v3822_v22 = vld [vmem:[%s7538_s1 + $0x318] sm:$0xff]  ;;  %v8180_v5 = vand.u32 4294901760, %v7019_v53 }
 0x150   :  { %8174 = vst [vmem:[#allocation5_spill] sm:$0xff] %v7092_v28  ;;  %4488 = vmatpush3.msra.mxu0 %v6861_v50  ;;  %8177 = vst [vmem:[#allocation33_spill] sm:$0xff] %v7113_v60  ;;  %v7139_v9 = vand.u32 4294901760, %v3823_v6  ;;  %v3838_v46 = vld [vmem:[%s7538_s1 + $0x398] sm:$0xff]  ;;  %v7158_v50 = vsub.f32 %v3841_v15, %v7086_v7  ;;  %v8188_v15 = vand.u32 4294901760, %v6984_v12 }
 0x151   :  { %8176 = vst [vmem:[#allocation22_spill] sm:$0xff] %v7099_v37  ;;  %4489 = vmatprep.subr.mxu0 %v6877_v4  ;;  %4516 = vmatprep.subr.mxu1 %v8178_v21  ;;  %v7135_v21 = vsub.f32 %v7019_v53, %v8180_v5  ;;  %v8183_v53 = vand.u32 4294901760, %v6936_v16  ;;  %v3837_v5 = vld [vmem:[%s7538_s1 + $0x390] sm:$0xff]  ;;  %v8186_v16 = vand.u32 4294901760, %v6955_v11  ;;  %v7189_v4 = vand.u32 4294901760, %v2863_v14 }
 0x152   :  { %4490 = vmatpush3.msra.mxu0 %v6901_v58  ;;  %4517 = vmatpush3.msra.mxu1 %v8179_v34  ;;  %8181 = vst [vmem:[#allocation27_spill] sm:$0xff] %v7139_v9  ;;  %v8182_v34 = vand.u32 4294901760, %v6892_v41  ;;  %v7154_v58 = vsub.f32 %v3824_v19, %v7099_v37  ;;  %v7166_v41 = vsub.f32 %v7061_v40, %v8184_v55  ;;  %v7184_v55 = vand.u32 4294901760, %v3821_v44 }
 0x153   :  { %4491 = vmatprep.subr.mxu0 %v6914_v56  ;;  %v7171_v19 = vsub.f32 %v7050_v1, %v8185_v29  ;;  %v7187_v29 = vsub.f32 %v3840_v31, %v7113_v60  ;;  %8187 = vst [vmem:[#allocation30_spill] sm:$0xff] %v7189_v4  ;;  %v8191_v31 = vand.u32 4294901760, %v6989_v24  ;;  %v8192_v56 = vand.u32 4294901760, %v7108_v25  ;;  %3203 = vmatprep.mubr.f32.mxu1 %v7189_v4 }
 0x154   :  { %4518 = vmatprep.subr.mxu1 %v8182_v34  ;;  %4492 = vmatpush3.msra.mxu0 %v6916_v26  ;;  %v7173_v34 = vand.u32 4294901760, %v3822_v22  ;;  %v3025_v26 = vand.u32 4294901760, %v7135_v21  ;;  %v7209_v12 = vand.u32 4294901760, %v3837_v5  ;;  %v8194_v24 = vand.u32 4294901760, %v7024_v47 }
 0x155   :  { %4519 = vmatpush3.msra.mxu1 %v8183_v53  ;;  %4493 = vmatprep.subr.mxu0 %v6938_v45  ;;  %v7182_v53 = vand.u32 4294901760, %v3838_v46  ;;  %v7196_v45 = vsub.f32 %v3823_v6, %v7139_v9  ;;  %v3836_v6 = vld [vmem:[%s7538_s1 + $0x388] sm:$0xff]  ;;  %v8195_v21 = vand.u32 4294901760, %v7092_v28  ;;  %v8196_v47 = vand.u32 4294901760, %v7029_v36 }
 0x156   :  { %4520 = vmatprep.subr.mxu1 %v8186_v16  ;;  %4494 = vmatpush3.msra.mxu0 %v6976_v42  ;;  %v7199_v16 = vand.u32 4294901760, %v2856_v38  ;;  %v7207_v42 = vsub.f32 %v7108_v25, %v8192_v56  ;;  %8193 = vst [vmem:[#allocation20_spill] sm:$0xff] %v7209_v12  ;;  %v3032_v56 = vand.u32 4294901760, %v7171_v19  ;;  %v7224_v11 = vsub.f32 %v3822_v22, %v7173_v34  ;;  %v3835_v22 = vld [vmem:[%s7538_s1 + $0x380] sm:$0xff] }
 0x157   :  { %4521 = vmatpush3.msra.mxu1 %v8188_v15  ;;  %8189 = vst [vmem:[#allocation34_spill] sm:$0xff] %v7196_v45  ;;  %4495 = vmatprep.subr.mxu0 %v6996_v27  ;;  %v7216_v15 = vsub.f32 %v3839_v39, %v7137_v20  ;;  %v3038_v27 = vsub.f32 %v7092_v28, %v8195_v21  ;;  %v3820_v39 = vld [vmem:[%s7538_s1 + $0x308] sm:$0xff]  ;;  %v3819_v21 = vld [vmem:[%s7538_s1 + $0x300] sm:$0xff]  ;;  %v8197_v36 = vand.u32 4294901760, %v7055_v30  ;;  %v7257_v19 = vand.u32 4294901760, %v3836_v6  ;;  %s4719_s1 = smov 8  }
 0x158   :  { %8190 = vst [vmem:[#allocation32_spill] sm:$0xff] %v7199_v16  ;;  %4522 = vmatprep.subr.mxu1 %v8191_v31  ;;  %4496 = vmatpush3.msra.mxu0 %v6998_v49  ;;  %v3144_v31 = vand.u32 4294901760, %v7166_v41  ;;  %v7236_v41 = vsub.f32 %v3821_v44, %v7184_v55  ;;  %v8198_v44 = vand.u32 4294901760, %v7122_v33  ;;  %v7261_v28 = vsub.f32 %v2856_v38, %v7199_v16 }
 0x159   :  { %4523 = vmatpush3.msra.mxu1 %v8194_v24  ;;  %4497 = vmatprep.subr.mxu0 %v7038_v17  ;;  %v7246_v24 = vsub.f32 %v2863_v14, %v7189_v4  ;;  %v7249_v17 = vsub.f32 %v3838_v46, %v7182_v53  ;;  %v8199_v14 = vand.u32 4294901760, %v7068_v54  ;;  %v3151_v46 = vand.u32 4294901760, %v7207_v42  ;;  %v8235_v4 = vld [vmem:[#allocation9_spill] sm:$0xff] }
 0x15a   :  { %4524 = vmatprep.subr.mxu1 %v8196_v47  ;;  %4498 = vmatpush3.msra.mxu0 %v7040_v13  ;;  %v3045_v47 = vsub.f32 %v7122_v33, %v8198_v44  ;;  %v8200_v30 = vand.u32 4294901760, %v7158_v50  ;;  %v7270_v13 = vand.u32 4294901760, %v3820_v39  ;;  %v8201_v38 = vand.u32 4294901760, %v7075_v0 }
 0x15b   :  { %4525 = vmatpush3.msra.mxu1 %v8197_v36  ;;  %4499 = vmatprep.subr.mxu0 %v7086_v7  ;;  %v7276_v49 = vand.u32 4294901760, %v3835_v22  ;;  %v7278_v7 = vand.u32 4294901760, %v3819_v21  ;;  %v7282_v42 = vsub.f32 %v3837_v5, %v7209_v12  ;;  %v8203_v44 = vand.u32 4294901760, %v7187_v29 }
 0x15c   :  { %4526 = vmatprep.subr.mxu1 %v8199_v14  ;;  %v3157_v36 = vsub.f32 %v7158_v50, %v8200_v30  ;;  %4500 = vmatpush3.msra.mxu0 %v7070_v10  ;;  %v8202_v14 = vand.u32 4294901760, %v7097_v48  ;;  %v3039_v30 = vand.u32 4294901760, %v3038_v27  ;;  %v3046_v54 = vand.u32 4294901760, %v3045_v47 }
 0x15d   :  { %4527 = vmatpush3.msra.mxu1 %v8201_v38  ;;  %4501 = vmatprep.subr.mxu0 %v7113_v60  ;;  %v3164_v0 = vsub.f32 %v7187_v29, %v8203_v44  ;;  %v7799_v38 = vand.u32 4294901760, %v7246_v24  ;;  %v8204_v5 = vand.u32 4294901760, %v7154_v58  ;;  %v7298_v27 = vsub.f32 %v3836_v6, %v7257_v19 }
 0x15e   :  { %4528 = vmatprep.subr.mxu1 %v8202_v14  ;;  %4502 = vmatpush3.msra.mxu0 %v7099_v37  ;;  %v3158_v44 = vand.u32 4294901760, %v3157_v36  ;;  %v7302_v14 = vsub.f32 %v3820_v39, %v7270_v13  ;;  %v8205_v10 = vand.u32 4294901760, %v7216_v15  ;;  %v8207_v6 = vand.u32 4294901760, %v7196_v45 }
 0x15f   :  { %4529 = vmatpush3.msra.mxu1 %v3025_v26  ;;  %v3052_v60 = vsub.f32 %v7154_v58, %v8204_v5  ;;  %4503 = vmatprep.subr.mxu0 %v7137_v20  ;;  %v7310_v5 = vsub.f32 %v3819_v21, %v7278_v7  ;;  %v7317_v39 = vsub.f32 %v3835_v22, %v7276_v49  ;;  %v8209_v21 = vand.u32 4294901760, %v7249_v17 }
 0x160   :  { %4530 = vmatprep.subr.mxu1 %v3144_v31  ;;  %v3171_v26 = vsub.f32 %v7216_v15, %v8205_v10  ;;  %4504 = vmatpush3.msra.mxu0 %v7139_v9  ;;  %v3059_v31 = vsub.f32 %v7196_v45, %v8207_v6  ;;  %v3165_v10 = vand.u32 4294901760, %v3164_v0  ;;  %v8210_v22 = vand.u32 4294901760, %v7261_v28 }
 0x161   :  { %4531 = vmatpush3.msra.mxu1 %v3032_v56  ;;  %8206 = vst [vmem:[#allocation23_spill] sm:$0xff] %v7310_v5  ;;  %8208 = vst [vmem:[#allocation26_spill] sm:$0xff] %v7317_v39  ;;  %4505 = vmatprep.subr.mxu0 %v7182_v53  ;;  %v2965_v56 = vsub.f32 %v7246_v24, %v7799_v38  ;;  %v3178_v47 = vsub.f32 %v7249_v17, %v8209_v21  ;;  %v3053_v6 = vand.u32 4294901760, %v3052_v60 }
 0x162   :  { %4532 = vmatprep.subr.mxu1 %v3151_v46  ;;  %4506 = vmatpush3.msra.mxu0 %v7173_v34  ;;  %v2971_v36 = vsub.f32 %v7261_v28, %v8210_v22  ;;  %v3172_v0 = vand.u32 4294901760, %v3171_v26  ;;  %v8211_v38 = vand.u32 4294901760, %v7224_v11  ;;  %v3060_v60 = vand.u32 4294901760, %v3059_v31 }
 0x163   :  { %4533 = vmatpush3.msra.mxu1 %v3039_v30  ;;  %4507 = vmatprep.subr.mxu0 %v7209_v12  ;;  %v8212_v30 = vand.u32 4294901760, %v7282_v42  ;;  %v7803_v46 = vand.u32 4294901760, %v7317_v39  ;;  %v3179_v26 = vand.u32 4294901760, %v3178_v47  ;;  %v8213_v12 = vand.u32 4294901760, %v7236_v41 }
 0x164   :  { %4534 = vmatprep.subr.mxu1 %v3158_v44  ;;  %v3066_v21 = vsub.f32 %v7224_v11, %v8211_v38  ;;  %4508 = vmatpush3.msra.mxu0 %v7184_v55  ;;  %v2966_v44 = vand.u32 4294901760, %v2965_v56  ;;  %v7802_v48 = vand.u32 4294901760, %v7310_v5  ;;  %v8214_v31 = vand.u32 4294901760, %v7298_v27 }
 0x165   :  { %4535 = vmatpush3.msra.mxu1 %v3046_v54  ;;  %v3185_v22 = vsub.f32 %v7282_v42, %v8212_v30  ;;  %4509 = vmatprep.subr.mxu0 %v7257_v19  ;;  %v3073_v38 = vsub.f32 %v7236_v41, %v8213_v12  ;;  %v2972_v54 = vand.u32 4294901760, %v2971_v36  ;;  %v8215_v47 = vand.u32 4294901760, %v7302_v14 }
 0x166   :  { %4536 = vmatprep.subr.mxu1 %v3165_v10  ;;  %4510 = vmatpush3.msra.mxu0 %v7270_v13  ;;  %v3192_v30 = vsub.f32 %v7298_v27, %v8214_v31  ;;  %v3067_v10 = vand.u32 4294901760, %v3066_v21  ;;  %v3199_v36 = vsub.f32 %v7317_v39, %v7803_v46  ;;  %v8219_v31 = vld [vmem:[#allocation12_spill] sm:$0xff] }
 0x167   :  { %4537 = vmatpush3.msra.mxu1 %v3053_v6  ;;  %4511 = vmatprep.subr.mxu0 %v7276_v49  ;;  %v3080_v56 = vsub.f32 %v7302_v14, %v8215_v47  ;;  %v3186_v12 = vand.u32 4294901760, %v3185_v22  ;;  %v3074_v6 = vand.u32 4294901760, %v3073_v38  ;;  %v8217_v38 = vld [vmem:[#allocation8_spill] sm:$0xff]  ;;  %v8222_v47 = vld [vmem:[#allocation15_spill] sm:$0xff] }
 0x168   :  { %4538 = vmatprep.subr.mxu1 %v3172_v0  ;;  %4512 = vmatpush3.msra.mxu0 %v7278_v7  ;;  %v3087_v0 = vsub.f32 %v7310_v5, %v7802_v48  ;;  %v3193_v21 = vand.u32 4294901760, %v3192_v30  ;;  %v3200_v22 = vand.u32 4294901760, %v3199_v36  ;;  %v8220_v30 = vld [vmem:[#allocation13_spill] sm:$0xff]  ;;  %v8225_v36 = vld [vmem:[#allocation6_spill] sm:$0xff]  ;;  %v8233_v46 = vld [vmem:[#allocation16_spill] sm:$0xff] }
 0x169   :  { %4539 = vmatpush3.msra.mxu1 %v3060_v60  ;;  %2967 = vmatprep.mubr.f32.mxu0 %v2966_v44  ;;  %v3081_v60 = vand.u32 4294901760, %v3080_v56  ;;  %v8223_v56 = vld [vmem:[#allocation14_spill] sm:$0xff]  ;;  %v8232_v48 = vld [vmem:[#allocation21_spill] sm:$0xff] }
 0x16a   :  { %4540 = vmatprep.subr.mxu1 %v3179_v26  ;;  %4551 = vmatprep.subr.mxu0 %v6783_v52  ;;  %v3088_v44 = vand.u32 4294901760, %v3087_v0  ;;  %v8216_v26 = vld [vmem:[#allocation11_spill] sm:$0xff] }
 0x16b   :  { %2973 = vmatmul.mubr.f32.vlgmr.msra.gmra.mxu0 %v2972_v54  ;;  %4541 = vmatpush3.msra.mxu1 %v3067_v10  ;;  %v8218_v54 = vld [vmem:[#allocation19_spill] sm:$0xff]  ;;  %v8221_v10 = vld [vmem:[#allocation24_spill] sm:$0xff] }
 0x16c   :  { %4552 = vmatpush3.msra.mxu0 %v6795_v51  ;;  %4542 = vmatprep.subr.mxu1 %v3186_v12  ;;  %v8224_v12 = vld [vmem:[#allocation5_spill] sm:$0xff]  ;;  %v8227_v0 = vld [vmem:[#allocation31_spill] sm:$0xff] }
 0x16d   :  { %4553 = vmatprep.subr.mxu0 %v6813_v61  ;;  %4543 = vmatpush3.msra.mxu1 %v3074_v6  ;;  %v8226_v6 = vld [vmem:[#allocation17_spill] sm:$0xff] }
 0x16e   :  { %4554 = vmatpush3.msra.mxu0 %v6839_v23  ;;  %4544 = vmatprep.subr.mxu1 %v3193_v21  ;;  %v8228_v21 = vld [vmem:[#allocation7_spill] sm:$0xff] }
 0x16f   :  { %4555 = vmatprep.subr.mxu0 %v6856_v18  ;;  %4545 = vmatpush3.msra.mxu1 %v3081_v60  ;;  %v8229_v60 = vld [vmem:[#allocation18_spill] sm:$0xff] }
 0x170   :  { %4556 = vmatpush3.msra.mxu0 %v6875_v2  ;;  %4546 = vmatprep.subr.mxu1 %v3200_v22  ;;  %v8230_v22 = vld [vmem:[#allocation25_spill] sm:$0xff] }
 0x171   :  { %4557 = vmatprep.subr.mxu0 %v6896_v32  ;;  %4547 = vmatpush3.msra.mxu1 %v3088_v44  ;;  %v8231_v44 = vld [vmem:[#allocation10_spill] sm:$0xff] }
 0x172   :  { %4558 = vmatpush3.msra.mxu0 %v6911_v63  ;;  %3205 = vmatmul.mubr.f32.vlgmr.msra.gmra.mxu1 %v7199_v16  ;;  %v8234_v16 = vld [vmem:[#allocation29_spill] sm:$0xff] }
 0x173   :  { %4559 = vmatprep.subr.mxu0 %v6922_v43  ;;  %4586 = vmatprep.subr.mxu1 %v6761_v8 }
 0x174   :  { %4560 = vmatpush3.msra.mxu0 %v6949_v59  ;;  %4587 = vmatpush3.msra.mxu1 %v6772_v62 }
 0x175   :  { %4561 = vmatprep.subr.mxu0 %v6971_v3  ;;  %4588 = vmatprep.subr.mxu1 %v6780_v35 }
 0x176   :  { %4562 = vmatpush3.msra.mxu0 %v6961_v57  ;;  %4589 = vmatpush3.msra.mxu1 %v8216_v26 }
 0x177   :  { %4563 = vmatprep.subr.mxu0 %v8217_v38  ;;  %4590 = vmatprep.subr.mxu1 %v8218_v54 }
 0x178   :  { %4564 = vmatpush3.msra.mxu0 %v8219_v31  ;;  %4591 = vmatpush3.msra.mxu1 %v8220_v30 }
 0x179   :  { %4565 = vmatprep.subr.mxu0 %v7061_v40  ;;  %4592 = vmatprep.subr.mxu1 %v8221_v10 }
 0x17a   :  { %4566 = vmatpush3.msra.mxu0 %v7050_v1  ;;  %4593 = vmatpush3.msra.mxu1 %v8222_v47 }
 0x17b   :  { %4567 = vmatprep.subr.mxu0 %v7108_v25  ;;  %4594 = vmatprep.subr.mxu1 %v8223_v56 }
 0x17c   :  { %4568 = vmatpush3.msra.mxu0 %v8224_v12  ;;  %4595 = vmatpush3.msra.mxu1 %v8225_v36 }
 0x17d   :  { %4569 = vmatprep.subr.mxu0 %v7158_v50  ;;  %4596 = vmatprep.subr.mxu1 %v8226_v6 }
 0x17e   :  { %4570 = vmatpush3.msra.mxu0 %v7122_v33  ;;  %4597 = vmatpush3.msra.mxu1 %v8227_v0 }
 0x17f   :  { %4571 = vmatprep.subr.mxu0 %v7187_v29  ;;  %4598 = vmatprep.subr.mxu1 %v8228_v21 }
 0x180   :  { %4572 = vmatpush3.msra.mxu0 %v7154_v58  ;;  %4599 = vmatpush3.msra.mxu1 %v8229_v60 }
 0x181   :  { %4573 = vmatprep.subr.mxu0 %v7216_v15  ;;  %4600 = vmatprep.subr.mxu1 %v8230_v22 }
 0x182   :  { %4574 = vmatpush3.msra.mxu0 %v7196_v45  ;;  %4601 = vmatpush3.msra.mxu1 %v8231_v44  ;;  %v8236_v45 = vld [vmem:[#allocation33_spill] sm:$0xff] }
 0x183   :  { %4575 = vmatprep.subr.mxu0 %v7249_v17  ;;  %4602 = vmatprep.subr.mxu1 %v8232_v48 }
 0x184   :  { %4576 = vmatpush3.msra.mxu0 %v7224_v11  ;;  %4603 = vmatpush3.msra.mxu1 %v8233_v46 }
 0x185   :  { %4577 = vmatprep.subr.mxu0 %v7282_v42  ;;  %4604 = vmatprep.subr.mxu1 %v8234_v16 }
 0x186   :  { %4578 = vmatpush3.msra.mxu0 %v7236_v41  ;;  %4605 = vmatpush3.msra.mxu1 %v8235_v4 }
 0x187   :  { %4579 = vmatprep.subr.mxu0 %v7298_v27  ;;  %4606 = vmatprep.subr.mxu1 %v8236_v45  ;;  %v8237_v45 = vand.u32 4294901760, %v6783_v52  ;;  %v8242_v52 = vand.u32 4294901760, %v6856_v18  ;;  %v8247_v18 = vand.u32 4294901760, %v7261_v28 }
 0x188   :  { %4580 = vmatpush3.msra.mxu0 %v7302_v14  ;;  %4607 = vmatpush3.msra.mxu1 %v7099_v37  ;;  %v8238_v37 = vand.u32 4294901760, %v6795_v51  ;;  %v8243_v51 = vand.u32 4294901760, %v6875_v2  ;;  %v4093_v2 = vpop.f32.mrf.mxu0 }
 0x189   :  { %4581 = vmatprep.subr.mxu0 %v7317_v39  ;;  %4608 = vmatprep.subr.mxu1 %v7137_v20  ;;  %v8239_v39 = vld [vmem:[#allocation20_spill] sm:$0xff] }
 0x18a   :  { %4582 = vmatpush3.msra.mxu0 %v7310_v5  ;;  %3340 = vmatprep.mubr.f32.mxu0 %v7246_v24  ;;  %v8240_v5 = vand.u32 4294901760, %v6813_v61  ;;  %v8244_v61 = vand.u32 4294901760, %v6896_v32  ;;  %v8249_v32 = vand.u32 4294901760, %v6949_v59  ;;  %v8253_v59 = vand.u32 4294901760, %v8219_v31 }
 0x18b   :  { %4609 = vmatpush3.msra.mxu1 %v7139_v9  ;;  %3343 = vmatmul.mubr.f32.vlgmr.msra.gmra.mxu0 %v7261_v28  ;;  %v8241_v9 = vand.u32 4294901760, %v6839_v23  ;;  %v8245_v23 = vand.u32 4294901760, %v7246_v24  ;;  %v8252_v28 = vand.u32 4294901760, %v8217_v38  ;;  %v8259_v38 = vand.u32 4294901760, %v7122_v33 }
 0x18c   :  { %4610 = vmatprep.subr.mxu1 %v7182_v53  ;;  %4621 = vmatprep.subr.mxu0 %v8237_v45  ;;  %v8248_v45 = vand.u32 4294901760, %v6922_v43  ;;  %v4128_v43 = vpop.f32.mrf.mxu1 }
 0x18d   :  { %4611 = vmatpush3.msra.mxu1 %v7173_v34  ;;  %4622 = vmatpush3.msra.mxu0 %v8238_v37  ;;  %v8246_v37 = vand.u32 4294901760, %v6911_v63  ;;  %v8251_v63 = vand.u32 4294901760, %v6961_v57  ;;  %v8255_v57 = vand.u32 4294901760, %v7050_v1 }
 0x18e   :  { %4612 = vmatprep.subr.mxu1 %v8239_v39  ;;  %4623 = vmatprep.subr.mxu0 %v8240_v5  ;;  %v4129_v24 = vpop.f32.mrf.mxu1  ;;  %v8257_v5 = vand.u32 4294901760, %v8224_v12  ;;  %v8266_v12 = vand.u32 4294901760, %v7224_v11  ;;  %v8270_v11 = vld [vmem:[#allocation33_spill] sm:$0xff] }
 0x18f   :  { %4613 = vmatpush3.msra.mxu1 %v7184_v55  ;;  %4624 = vmatpush3.msra.mxu0 %v8241_v9  ;;  %v8250_v9 = vand.u32 4294901760, %v6971_v3  ;;  %v8256_v3 = vand.u32 4294901760, %v7108_v25  ;;  %v8260_v25 = vand.u32 4294901760, %v7187_v29  ;;  %v4130_v31 = vadd.f32 %v4129_v24, %v4128_v43 }
 0x190   :  { %4614 = vmatprep.subr.mxu1 %v7257_v19  ;;  %4625 = vmatprep.subr.mxu0 %v8242_v52 }
 0x191   :  { %4615 = vmatpush3.msra.mxu1 %v7270_v13  ;;  %4626 = vmatpush3.msra.mxu0 %v8243_v51 }
 0x192   :  { %4616 = vmatprep.subr.mxu1 %v7276_v49  ;;  %4627 = vmatprep.subr.mxu0 %v8244_v61  ;;  %v8278_v61 = vld [vmem:[#allocation27_spill] sm:$0xff] }
 0x193   :  { %4617 = vmatpush3.msra.mxu1 %v7278_v7  ;;  %3447 = vmatprep.mubr.f32.mxu1 %v8245_v23  ;;  %v8279_v23 = vld [vmem:[#allocation32_spill] sm:$0xff] }
 0x194   :  { %4628 = vmatpush3.msra.mxu0 %v8246_v37  ;;  %3451 = vmatmul.mubr.f32.vlgmr.msra.gmra.mxu1 %v8247_v18 }
 0x195   :  { %4629 = vmatprep.subr.mxu0 %v8248_v45  ;;  %4656 = vmatprep.subr.mxu1 %v6761_v8  ;;  %v4094_v8 = vpop.f32.mrf.mxu0 }
 0x196   :  { %4630 = vmatpush3.msra.mxu0 %v8249_v32  ;;  %4657 = vmatpush3.msra.mxu1 %v6772_v62  ;;  %v8254_v62 = vand.u32 4294901760, %v7061_v40  ;;  %v8258_v40 = vand.u32 4294901760, %v7158_v50  ;;  %v4095_v29 = vadd.f32 %v4094_v8, %v4093_v2 }
 0x197   :  { %4631 = vmatprep.subr.mxu0 %v8250_v9  ;;  %4658 = vmatprep.subr.mxu1 %v6780_v35  ;;  %v4163_v35 = vpop.f32.mrf.mxu0 }
 0x198   :  { %4632 = vmatpush3.msra.mxu0 %v8251_v63  ;;  %4659 = vmatpush3.msra.mxu1 %v8216_v26  ;;  %v4198_v26 = vpop.f32.mrf.mxu1 }
 0x199   :  { %4633 = vmatprep.subr.mxu0 %v8252_v28  ;;  %4660 = vmatprep.subr.mxu1 %v8218_v54  ;;  %v4164_v1 = vpop.f32.mrf.mxu0  ;;  %v8261_v54 = vand.u32 4294901760, %v7154_v58  ;;  %v8265_v58 = vand.u32 4294901760, %v7249_v17 }
 0x19a   :  { %4634 = vmatpush3.msra.mxu0 %v8253_v59  ;;  %4661 = vmatpush3.msra.mxu1 %v8220_v30  ;;  %v8262_v30 = vand.u32 4294901760, %v7216_v15  ;;  %v4199_v33 = vpop.f32.mrf.mxu1 }
 0x19b   :  { %4635 = vmatprep.subr.mxu0 %v8254_v62  ;;  %4662 = vmatprep.subr.mxu1 %v8221_v10  ;;  %v8263_v10 = vld [vmem:[#allocation34_spill] sm:$0xff] }
 0x19c   :  { %4636 = vmatpush3.msra.mxu0 %v8255_v57  ;;  %4663 = vmatpush3.msra.mxu1 %v8222_v47  ;;  %v8264_v47 = vand.u32 4294901760, %v8263_v10 }
 0x19d   :  { %4637 = vmatprep.subr.mxu0 %v8256_v3  ;;  %4664 = vmatprep.subr.mxu1 %v8223_v56  ;;  %v4165_v56 = vadd.f32 %v4164_v1, %v4163_v35 }
 0x19e   :  { %4638 = vmatpush3.msra.mxu0 %v8257_v5  ;;  %4665 = vmatpush3.msra.mxu1 %v8225_v36  ;;  %v1343_v36 = vadd.f32 %v4130_v31, %v4095_v29 }
 0x19f   :  { %4639 = vmatprep.subr.mxu0 %v8258_v40  ;;  %4666 = vmatprep.subr.mxu1 %v8226_v6  ;;  %v4233_v50 = vpop.f32.mrf.mxu0  ;;  %v4200_v6 = vadd.f32 %v4199_v33, %v4198_v26 }
 0x1a0   :  { %4640 = vmatpush3.msra.mxu0 %v8259_v38  ;;  %4667 = vmatpush3.msra.mxu1 %v8227_v0  ;;  %v8267_v0 = vand.u32 4294901760, %v7282_v42  ;;  %v1481_v17 = vadd.f32 %v4165_v56, %v1343_v36 }
 0x1a1   :  { %4641 = vmatprep.subr.mxu0 %v8260_v25  ;;  %4668 = vmatprep.subr.mxu1 %v8228_v21  ;;  %v4234_v15 = vpop.f32.mrf.mxu0  ;;  %v8268_v21 = vand.u32 4294901760, %v7236_v41 }
 0x1a2   :  { %4642 = vmatpush3.msra.mxu0 %v8261_v54  ;;  %4669 = vmatpush3.msra.mxu1 %v8229_v60  ;;  %v8271_v60 = vand.u32 4294901760, %v7302_v14 }
 0x1a3   :  { %4643 = vmatprep.subr.mxu0 %v8262_v30  ;;  %4670 = vmatprep.subr.mxu1 %v8230_v22  ;;  %v8272_v22 = vld [vmem:[#allocation22_spill] sm:$0xff] }
 0x1a4   :  { %4644 = vmatpush3.msra.mxu0 %v8264_v47  ;;  %4671 = vmatpush3.msra.mxu1 %v8231_v44  ;;  %v1589_v44 = vadd.f32 %v4200_v6, %v1481_v17 }
 0x1a5   :  { %4645 = vmatprep.subr.mxu0 %v8265_v58  ;;  %4672 = vmatprep.subr.mxu1 %v8232_v48  ;;  %v8269_v48 = vand.u32 4294901760, %v7298_v27  ;;  %v8277_v27 = vld [vmem:[#allocation30_spill] sm:$0xff] }
 0x1a6   :  { %4646 = vmatpush3.msra.mxu0 %v8266_v12  ;;  %4673 = vmatpush3.msra.mxu1 %v8233_v46  ;;  %v4235_v46 = vadd.f32 %v4234_v15, %v4233_v50 }
 0x1a7   :  { %4647 = vmatprep.subr.mxu0 %v8267_v0  ;;  %4674 = vmatprep.subr.mxu1 %v8234_v16  ;;  %v8273_v16 = vld [vmem:[#allocation26_spill] sm:$0xff] }
 0x1a8   :  { %4648 = vmatpush3.msra.mxu0 %v8268_v21  ;;  %4675 = vmatpush3.msra.mxu1 %v8235_v4  ;;  %v4268_v42 = vpop.f32.mrf.mxu1  ;;  %v8274_v52 = vand.u32 4294901760, %v8273_v16  ;;  %v8275_v4 = vld [vmem:[#allocation23_spill] sm:$0xff]  ;;  %v1757_v14 = vadd.f32 %v4235_v46, %v1589_v44 }
 0x1a9   :  { %4649 = vmatprep.subr.mxu0 %v8269_v48  ;;  %4676 = vmatprep.subr.mxu1 %v8270_v11  ;;  %v8276_v41 = vand.u32 4294901760, %v8275_v4 }
 0x1aa   :  { %4650 = vmatpush3.msra.mxu0 %v8271_v60  ;;  %4677 = vmatpush3.msra.mxu1 %v8272_v22  ;;  %v4269_v51 = vpop.f32.mrf.mxu1 }
 0x1ab   :  { %4651 = vmatprep.subr.mxu0 %v8274_v52  ;;  %4678 = vmatprep.subr.mxu1 %v7137_v20  ;;  %v4270_v37 = vadd.f32 %v4269_v51, %v4268_v42 }
 0x1ac   :  { %4652 = vmatpush3.msra.mxu0 %v8276_v41  ;;  %3617 = vmatprep.mubr.f32.mxu0 %v8277_v27 }
 0x1ad   :  { %4679 = vmatpush3.msra.mxu1 %v8278_v61  ;;  %3619 = vmatmul.mubr.f32.vlgmr.msra.gmra.mxu0 %v8279_v23  ;;  %v1861_v18 = vadd.f32 %v4270_v37, %v1757_v14 }
 0x1ae   :  { %4680 = vmatprep.subr.mxu1 %v7182_v53  ;;  %3721 = vmatprep.mubr.f32.mxu1 %v8277_v27 }
 0x1af   :  { %4681 = vmatpush3.msra.mxu1 %v7173_v34  ;;  %1865 = vrot.lane.b32.xlu0 %v1861_v18, %s4719_s1 }
 0x1b0   :  { %4682 = vmatprep.subr.mxu1 %v8239_v39 }
 0x1b1   :  { %4683 = vmatpush3.msra.mxu1 %v7184_v55 }
 0x1b2   :  { %4684 = vmatprep.subr.mxu1 %v7257_v19 }
 0x1b3   :  { %4685 = vmatpush3.msra.mxu1 %v7270_v13 }
 0x1b4   :  { %4686 = vmatprep.subr.mxu1 %v7276_v49 }
 0x1b5   :  { %4687 = vmatpush3.msra.mxu1 %v7278_v7 }
 0x1b6   :  { %3723 = vmatmul.mubr.f32.vlgmr.msra.gmra.mxu1 %v8279_v23 }
 0x1c3   :  { %v4303_v20 = vpop.f32.mrf.mxu0 }
 0x1c5   :  { %v4304_v53 = vpop.f32.mrf.mxu0 }
 0x1c6   :  { %v4305_v28 = vadd.f32 %v4304_v53, %v4303_v20 }
 0x1cb   :  { %v4338_v34 = vpop.f32.mrf.mxu1 }
 0x1cd   :  { %v4339_v2 = vpop.f32.mrf.mxu1 }
 0x1ce   :  { %v4340_v9 = vadd.f32 %v4339_v2, %v4338_v34 }
 0x1d0   :  { %v2275_v13 = vadd.f32 %v4340_v9, %v4305_v28 }
 0x1e4   :  { %v4373_v45 = vpop.f32.mrf.mxu0 }
 0x1e6   :  { %v4374_v39 = vpop.f32.mrf.mxu0 }
 0x1e7   :  { %v4375_v19 = vadd.f32 %v4374_v39, %v4373_v45 }
 0x1e9   :  { %v2413_v49 = vadd.f32 %v4375_v19, %v2275_v13 }
 0x1ed   :  { %v4408_v32 = vpop.f32.mrf.mxu1 }
 0x1ef   :  { %v4409_v63 = vpop.f32.mrf.mxu1 }
 0x1f0   :  { %v4410_v43 = vadd.f32 %v4409_v63, %v4408_v32 }
 0x1f2   :  { %v2521_v62 = vadd.f32 %v4410_v43, %v2413_v49 }
 0x209   :  { %v4443_v55 = vpop.f32.mrf.mxu0 }
 0x20b   :  { %v4444_v8 = vpop.f32.mrf.mxu0 }
 0x20c   :  { %v4445_v59 = vadd.f32 %v4444_v8, %v4443_v55 }
 0x20e   :  { %v2689_v57 = vadd.f32 %v4445_v59, %v2521_v62 }
 0x20f   :  { %v4478_v7 = vpop.f32.mrf.mxu1 }
 0x211   :  { %v4479_v35 = vpop.f32.mrf.mxu1 }
 0x212   :  { %v4480_v3 = vadd.f32 %v4479_v35, %v4478_v7 }
 0x214   :  { %v2793_v24 = vadd.f32 %v4480_v3, %v2689_v57 }
 0x216   :  { %2797 = vrot.lane.b32.xlu0 %v2793_v24, %s4720_s27 }
 0x221   :  { %v1866_v5 = vpop.permute.xlu0 %1865 }
 0x222   :  { %1869 = vst.msk [vmem:[#allocation2] sm:$0x3] %vm1868_vm1, %v1866_v5 }
 0x22b   :  { %v4513_v40 = vpop.f32.mrf.mxu0 }
 0x22d   :  { %v4514_v1 = vpop.f32.mrf.mxu0 }
 0x22e   :  { %v4515_v10 = vadd.f32 %v4514_v1, %v4513_v40 }
 0x232   :  { %v4548_v26 = vpop.f32.mrf.mxu1 }
 0x234   :  { %v4549_v25 = vpop.f32.mrf.mxu1 }
 0x235   :  { %v4550_v30 = vadd.f32 %v4549_v25, %v4548_v26 }
 0x237   :  { %v3207_v56 = vadd.f32 %v4550_v30, %v4515_v10 }
 0x24b   :  { %v4583_v38 = vpop.f32.mrf.mxu0 }
 0x24d   :  { %v4584_v54 = vpop.f32.mrf.mxu0 }
 0x24e   :  { %v4585_v47 = vadd.f32 %v4584_v54, %v4583_v38 }
 0x250   :  { %v3345_v12 = vadd.f32 %v4585_v47, %v3207_v56 }
 0x254   :  { %v4618_v50 = vpop.f32.mrf.mxu1 }
 0x256   :  { %v4619_v33 = vpop.f32.mrf.mxu1 }
 0x257   :  { %v4620_v58 = vadd.f32 %v4619_v33, %v4618_v50 }
 0x259   :  { %v3453_v6 = vadd.f32 %v4620_v58, %v3345_v12 }
 0x26d   :  { %v4653_v31 = vpop.f32.mrf.mxu0 }
 0x26f   :  { %v4654_v29 = vpop.f32.mrf.mxu0 }
 0x270   :  { %v4655_v15 = vadd.f32 %v4654_v29, %v4653_v31 }
 0x272   :  { %v3621_v21 = vadd.f32 %v4655_v15, %v3453_v6 }
 0x276   :  { %v4688_v36 = vpop.f32.mrf.mxu1 }
 0x278   :  { %v4689_v0 = vpop.f32.mrf.mxu1 }
 0x279   :  { %v4690_v17 = vadd.f32 %v4689_v0, %v4688_v36 }
 0x27b   :  { %v3725_v48 = vadd.f32 %v4690_v17, %v3621_v21 }
 0x27d   :  { %3729 = vrot.lane.b32.xlu1 %v3725_v48, %s4721_s28 }
 0x288   :  { %v2798_v11 = vpop.permute.xlu0 %2797 }
 0x289   :  { %2801 = vst.msk [vmem:[#allocation2] sm:$0x3] %vm2800_vm2, %v2798_v11 }
 0x2ef   :  { %v3730_v46 = vpop.permute.xlu1 %3729 }
 0x2f0   :  { %3733 = vst.msk [vmem:[#allocation2] sm:$0x3] %vm3732_vm3, %v3730_v46 }
 0x2f1   :  { %4707 = shalt.err (!%p4704_p4)
}
 0x2f2   :  { %3743 = dma.vmem_to_hbm [thread:$0]  %s3741_s30, 32, %s7539_s2, [#allocation3]  }
 0x2f3   :  { %4716 = dma.done.wait [#allocation3], 32  }
 0x2f4   :  { %4717 = vsyncadd [#allocation3], 4294967264 }
 0x2f5   :  { %3747 = vsyncpa [#allocation3], 1 }

</bundles_post_ra>
